<compile_context>
chip_gen: v6e
topology: v6e:2x2x1
jax: 0.10.0
libtpu: 0.0.40
codegen_flags: <defaults>
</compile_context>

<pallas_src>
import jax
import jax.numpy as jnp
from jax.experimental import pallas as pl
from jax.experimental.pallas import tpu as pltpu

LANE = 128  # TPU lane width; all feature dims are padded to a multiple of this.


def _round_up(n, m):
    return ((n + m - 1) // m) * m


def _pad_to(a, shape):
    pads = [(0, t - s) for s, t in zip(a.shape, shape)]
    return jnp.pad(a, pads)


def vae_kernel(x_ref, eps_ref,
               we1_ref, be1_ref, we2_ref, be2_ref,
               wmv_ref, bmv_ref,
               wd1_ref, bd1_ref, wd2_ref, bd2_ref,
               wout_ref, bout_ref,
               recon_ref, muvar_ref):
    """One batch tile of the full VAE forward pass."""
    x = x_ref[...]                                           # (TB, I) bf16

    # ---- encoder: Linear -> ReLU -> Linear -> ReLU ----
    h = jnp.dot(x, we1_ref[...], preferred_element_type=jnp.float32) + be1_ref[...]
    h = jnp.maximum(h, 0.0).astype(jnp.bfloat16)
    h = jnp.dot(h, we2_ref[...], preferred_element_type=jnp.float32) + be2_ref[...]
    h = jnp.maximum(h, 0.0).astype(jnp.bfloat16)

    # ---- fused latent heads: one (H2, 2L) matmul -> [mu | logvar] ----
    muvar = jnp.dot(h, wmv_ref[...], preferred_element_type=jnp.float32) + bmv_ref[...]
    Lp = wd1_ref.shape[0]                                    # padded latent dim (x128)
    mu = muvar[:, :Lp]
    logvar = muvar[:, Lp:]

    # ---- reparameterization: z = mu + eps * exp(0.5*logvar) ----
    std = jnp.exp(0.5 * logvar)
    z = (mu + eps_ref[...] * std).astype(jnp.bfloat16)

    # ---- decoder: Linear -> ReLU -> Linear -> ReLU -> Linear ----
    d = jnp.dot(z, wd1_ref[...], preferred_element_type=jnp.float32) + bd1_ref[...]
    d = jnp.maximum(d, 0.0).astype(jnp.bfloat16)
    d = jnp.dot(d, wd2_ref[...], preferred_element_type=jnp.float32) + bd2_ref[...]
    d = jnp.maximum(d, 0.0).astype(jnp.bfloat16)
    recon = jnp.dot(d, wout_ref[...], preferred_element_type=jnp.float32) + bout_ref[...]

    recon_ref[...] = recon                                   # (TB, I)   f32, lane-dense
    muvar_ref[...] = muvar                                   # (TB, 2L)  f32, lane-dense


def _prepare_params(params, input_dim, latent_dim, h1, h2):
    """Zero-pad all dims to 128 lanes, cast weights to bf16, fuse mu/logvar head."""
    I = _round_up(input_dim, LANE)
    H1 = _round_up(h1, LANE)
    H2 = _round_up(h2, LANE)
    L = _round_up(latent_dim, LANE)

    def w(a, r, c):
        return _pad_to(a, (r, c)).astype(jnp.bfloat16)

    def b(a, c):
        return _pad_to(a, (1, c)).astype(jnp.float32)

    pp = {
        "w_e1": w(params["w_e1"], I, H1),    "b_e1": b(params["b_e1"], H1),
        "w_e2": w(params["w_e2"], H1, H2),   "b_e2": b(params["b_e2"], H2),
        "w_mv": jnp.concatenate([w(params["w_mu"], H2, L),
                                 w(params["w_lv"], H2, L)], axis=1),
        "b_mv": jnp.concatenate([b(params["b_mu"], L),
                                 b(params["b_lv"], L)], axis=1),
        "w_d1": w(params["w_d1"], L, H2),    "b_d1": b(params["b_d1"], H2),
        "w_d2": w(params["w_d2"], H2, H1),   "b_d2": b(params["b_d2"], H1),
        "w_out": w(params["w_out"], H1, I),  "b_out": b(params["b_out"], I),
    }
    return pp, (I, H1, H2, L)


def vae_forward(x, eps, params, hidden_layers, *, tile_b=256):
    """Full VAE forward pass. Returns (reconstructed, mu, logvar) at logical shapes."""
    B, input_dim = x.shape
    latent_dim = eps.shape[1]
    h1, h2 = hidden_layers

    pp, (I, H1, H2, L) = _prepare_params(params, input_dim, latent_dim, h1, h2)

    Bp = _round_up(B, tile_b)
    x_p = _pad_to(x, (Bp, I)).astype(jnp.bfloat16)   # bf16 input halves HBM->VMEM DMA
    eps_p = _pad_to(eps, (Bp, L)).astype(jnp.float32)

    grid = (pl.cdiv(Bp, tile_b),)

    def row_spec(cols):
        return pl.BlockSpec((tile_b, cols), lambda i: (i, 0))

    def resident_spec(arr):
        # Full-array block + constant index -> fetched once, stays VMEM-resident.
        return pl.BlockSpec(arr.shape, lambda i: (0, 0))

    weight_keys = ("w_e1", "b_e1", "w_e2", "b_e2", "w_mv", "b_mv",
                   "w_d1", "b_d1", "w_d2", "b_d2", "w_out", "b_out")
    weights = tuple(pp[k] for k in weight_keys)

    in_specs = [row_spec(I), row_spec(L)] + [resident_spec(w) for w in weights]
    out_specs = (row_spec(I), row_spec(2 * L))
    out_shape = (
        jax.ShapeDtypeStruct((Bp, I), jnp.float32),      # reconstructed (padded)
        jax.ShapeDtypeStruct((Bp, 2 * L), jnp.float32),  # [mu | logvar] lane-packed
    )

    # Scheduling hints: matmul flops, exp count, total HBM bytes touched.
    matmul_flops = 2 * Bp * (I * H1 + H1 * H2 + H2 * 2 * L
                             + L * H2 + H2 * H1 + H1 * I)
    weight_bytes = sum(int(w.size) * w.dtype.itemsize for w in weights)
    bytes_accessed = (x_p.size * x_p.dtype.itemsize
                      + eps_p.size * eps_p.dtype.itemsize
                      + weight_bytes
                      + Bp * I * 4 + Bp * 2 * L * 4)

    recon_p, muvar_p = pl.pallas_call(
        vae_kernel,
        grid=grid,
        in_specs=in_specs,
        out_specs=out_specs,
        out_shape=out_shape,
        compiler_params=pltpu.CompilerParams(
            dimension_semantics=("parallel",),   # batch tiles shard across TCs on v7x
            vmem_limit_bytes=32 * 1024 * 1024,   # safe on v5e/v6e/v7x (64 MiB physical)
        ),
        cost_estimate=pl.CostEstimate(
            flops=matmul_flops,
            transcendentals=Bp * L,
            bytes_accessed=bytes_accessed,
        ),
    )(x_p, eps_p, *weights)

    recon = recon_p[:B, :input_dim]
    mu = muvar_p[:B, :latent_dim]
    logvar = muvar_p[:B, L:L + latent_dim]
    return recon, mu, logvar


def init_params(key, input_dim, latent_dim, hidden_layers):
    """Deterministic synthetic parameter init (torch-Linear-like uniform), f32 (in,out) layout."""
    assert len(hidden_layers) == 2, "this script instantiates hidden_layers=[h1, h2]"
    h1, h2 = hidden_layers

    def linear(k, fan_in, fan_out):
        k1, k2 = jax.random.split(k)
        bound = 1.0 / jnp.sqrt(fan_in)
        w = jax.random.uniform(k1, (fan_in, fan_out), jnp.float32, -bound, bound)
        b = jax.random.uniform(k2, (1, fan_out), jnp.float32, -bound, bound)
        return w, b

    keys = jax.random.split(key, 7)
    p = {}
    p["w_e1"], p["b_e1"] = linear(keys[0], input_dim, h1)
    p["w_e2"], p["b_e2"] = linear(keys[1], h1, h2)
    p["w_mu"], p["b_mu"] = linear(keys[2], h2, latent_dim)
    p["w_lv"], p["b_lv"] = linear(keys[3], h2, latent_dim)
    p["w_d1"], p["b_d1"] = linear(keys[4], latent_dim, h2)
    p["w_d2"], p["b_d2"] = linear(keys[5], h2, h1)
    p["w_out"], p["b_out"] = linear(keys[6], h1, input_dim)
    return p


if __name__ == "__main__":
    # Small shapes consistent with the module: dense 2-D feature matrices.
    batch = 8
    input_dim = 128
    latent_dim = 16
    hidden_layers = [64, 32]

    key = jax.random.PRNGKey(0)
    k_x, k_eps, k_params = jax.random.split(key, 3)

    x = jax.random.normal(k_x, (batch, input_dim), jnp.float32)
    # eps ~ N(0,1) for the reparameterization trick (generated host-side so the
    # run is deterministic; matches torch.randn_like semantics).
    eps = jax.random.normal(k_eps, (batch, latent_dim), jnp.float32)

    params = init_params(k_params, input_dim, latent_dim, hidden_layers)

    recon, mu, logvar = vae_forward(x, eps, params, hidden_layers)
    jax.block_until_ready((recon, mu, logvar))

    assert recon.shape == (batch, input_dim)
    assert mu.shape == (batch, latent_dim)
    assert logvar.shape == (batch, latent_dim)
    assert bool(jnp.all(jnp.isfinite(recon)))
    assert bool(jnp.all(jnp.isfinite(mu)))
    assert bool(jnp.all(jnp.isfinite(logvar)))

    print("KERNEL_OK")
</pallas_src>

<mosaic_0001>
module attributes {stable_mosaic.version = 11 : i64} {
  func.func @vae_kernel(%arg0: i32, %arg1: memref<256x128xbf16, #tpu.memory_space<vmem>>, %arg2: memref<256x128xf32, #tpu.memory_space<vmem>>, %arg3: memref<128x128xbf16, #tpu.memory_space<vmem>>, %arg4: memref<1x128xf32, #tpu.memory_space<vmem>>, %arg5: memref<128x128xbf16, #tpu.memory_space<vmem>>, %arg6: memref<1x128xf32, #tpu.memory_space<vmem>>, %arg7: memref<128x256xbf16, #tpu.memory_space<vmem>>, %arg8: memref<1x256xf32, #tpu.memory_space<vmem>>, %arg9: memref<128x128xbf16, #tpu.memory_space<vmem>>, %arg10: memref<1x128xf32, #tpu.memory_space<vmem>>, %arg11: memref<128x128xbf16, #tpu.memory_space<vmem>>, %arg12: memref<1x128xf32, #tpu.memory_space<vmem>>, %arg13: memref<128x128xbf16, #tpu.memory_space<vmem>>, %arg14: memref<1x128xf32, #tpu.memory_space<vmem>>, %arg15: memref<256x128xf32, #tpu.memory_space<vmem>>, %arg16: memref<256x256xf32, #tpu.memory_space<vmem>>) attributes {dimension_semantics = [#tpu.dimension_semantics<parallel>], iteration_bounds = array<i64: 1>, scalar_prefetch = 0 : i64, scratch_operands = 0 : i64, tpu.core_type = #tpu.core_type<tc>, window_params = [{transform_indices = @transform_0, window_bounds = array<i64: 256, 128>}, {transform_indices = @transform_1, window_bounds = array<i64: 256, 128>}, {pipeline_mode = #tpu.pipeline_mode<synchronous>, transform_indices = @transform_2, window_bounds = array<i64: 128, 128>}, {pipeline_mode = #tpu.pipeline_mode<synchronous>, transform_indices = @transform_3, window_bounds = array<i64: 1, 128>}, {pipeline_mode = #tpu.pipeline_mode<synchronous>, transform_indices = @transform_4, window_bounds = array<i64: 128, 128>}, {pipeline_mode = #tpu.pipeline_mode<synchronous>, transform_indices = @transform_5, window_bounds = array<i64: 1, 128>}, {pipeline_mode = #tpu.pipeline_mode<synchronous>, transform_indices = @transform_6, window_bounds = array<i64: 128, 256>}, {pipeline_mode = #tpu.pipeline_mode<synchronous>, transform_indices = @transform_7, window_bounds = array<i64: 1, 256>}, {pipeline_mode = #tpu.pipeline_mode<synchronous>, transform_indices = @transform_8, window_bounds = array<i64: 128, 128>}, {pipeline_mode = #tpu.pipeline_mode<synchronous>, transform_indices = @transform_9, window_bounds = array<i64: 1, 128>}, {pipeline_mode = #tpu.pipeline_mode<synchronous>, transform_indices = @transform_10, window_bounds = array<i64: 128, 128>}, {pipeline_mode = #tpu.pipeline_mode<synchronous>, transform_indices = @transform_11, window_bounds = array<i64: 1, 128>}, {pipeline_mode = #tpu.pipeline_mode<synchronous>, transform_indices = @transform_12, window_bounds = array<i64: 128, 128>}, {pipeline_mode = #tpu.pipeline_mode<synchronous>, transform_indices = @transform_13, window_bounds = array<i64: 1, 128>}, {transform_indices = @transform_14, window_bounds = array<i64: 256, 128>}, {transform_indices = @transform_15, window_bounds = array<i64: 256, 256>}]} {
    %c0 = arith.constant 0 : index
    %c0_0 = arith.constant 0 : index
    %0 = vector.load %arg1[%c0, %c0_0] : memref<256x128xbf16, #tpu.memory_space<vmem>>, vector<256x128xbf16>
    %c0_1 = arith.constant 0 : index
    %c0_2 = arith.constant 0 : index
    %1 = vector.load %arg3[%c0_1, %c0_2] : memref<128x128xbf16, #tpu.memory_space<vmem>>, vector<128x128xbf16>
    %cst = arith.constant dense<0.000000e+00> : vector<256x128xf32>
    %2 = tpu.matmul %0, %1, %cst {dimension_numbers = #tpu.dot_dimension_numbers<[1], [0], [0], [1], [0, 0, 1, 1], [], []>} : vector<256x128xbf16>, vector<128x128xbf16>, vector<256x128xf32> -> vector<256x128xf32>
    %c0_3 = arith.constant 0 : index
    %c0_4 = arith.constant 0 : index
    %3 = vector.load %arg4[%c0_3, %c0_4] : memref<1x128xf32, #tpu.memory_space<vmem>>, vector<1x128xf32>
    %4 = vector.broadcast %3 : vector<1x128xf32> to vector<256x128xf32>
    %5 = arith.addf %2, %4 : vector<256x128xf32>
    %cst_5 = arith.constant 0.000000e+00 : f32
    %6 = vector.broadcast %cst_5 : f32 to vector<256x128xf32>
    %7 = arith.maximumf %5, %6 : vector<256x128xf32>
    %8 = arith.truncf %7 : vector<256x128xf32> to vector<256x128xbf16>
    %c0_6 = arith.constant 0 : index
    %c0_7 = arith.constant 0 : index
    %9 = vector.load %arg5[%c0_6, %c0_7] : memref<128x128xbf16, #tpu.memory_space<vmem>>, vector<128x128xbf16>
    %cst_8 = arith.constant dense<0.000000e+00> : vector<256x128xf32>
    %10 = tpu.matmul %8, %9, %cst_8 {dimension_numbers = #tpu.dot_dimension_numbers<[1], [0], [0], [1], [0, 0, 1, 1], [], []>} : vector<256x128xbf16>, vector<128x128xbf16>, vector<256x128xf32> -> vector<256x128xf32>
    %c0_9 = arith.constant 0 : index
    %c0_10 = arith.constant 0 : index
    %11 = vector.load %arg6[%c0_9, %c0_10] : memref<1x128xf32, #tpu.memory_space<vmem>>, vector<1x128xf32>
    %12 = vector.broadcast %11 : vector<1x128xf32> to vector<256x128xf32>
    %13 = arith.addf %10, %12 : vector<256x128xf32>
    %cst_11 = arith.constant 0.000000e+00 : f32
    %14 = vector.broadcast %cst_11 : f32 to vector<256x128xf32>
    %15 = arith.maximumf %13, %14 : vector<256x128xf32>
    %16 = arith.truncf %15 : vector<256x128xf32> to vector<256x128xbf16>
    %c0_12 = arith.constant 0 : index
    %c0_13 = arith.constant 0 : index
    %17 = vector.load %arg7[%c0_12, %c0_13] : memref<128x256xbf16, #tpu.memory_space<vmem>>, vector<128x256xbf16>
    %cst_14 = arith.constant dense<0.000000e+00> : vector<256x256xf32>
    %18 = tpu.matmul %16, %17, %cst_14 {dimension_numbers = #tpu.dot_dimension_numbers<[1], [0], [0], [1], [0, 0, 1, 1], [], []>} : vector<256x128xbf16>, vector<128x256xbf16>, vector<256x256xf32> -> vector<256x256xf32>
    %c0_15 = arith.constant 0 : index
    %c0_16 = arith.constant 0 : index
    %19 = vector.load %arg8[%c0_15, %c0_16] : memref<1x256xf32, #tpu.memory_space<vmem>>, vector<1x256xf32>
    %20 = vector.broadcast %19 : vector<1x256xf32> to vector<256x256xf32>
    %21 = arith.addf %18, %20 : vector<256x256xf32>
    %22 = vector.extract_strided_slice %21 {offsets = [0, 0], sizes = [256, 128], strides = [1, 1]} : vector<256x256xf32> to vector<256x128xf32>
    %23 = vector.extract_strided_slice %21 {offsets = [0, 128], sizes = [256, 128], strides = [1, 1]} : vector<256x256xf32> to vector<256x128xf32>
    %cst_17 = arith.constant 5.000000e-01 : f32
    %24 = vector.broadcast %cst_17 : f32 to vector<256x128xf32>
    %25 = arith.mulf %24, %23 : vector<256x128xf32>
    %26 = math.exp %25 : vector<256x128xf32>
    %c0_18 = arith.constant 0 : index
    %c0_19 = arith.constant 0 : index
    %27 = vector.load %arg2[%c0_18, %c0_19] : memref<256x128xf32, #tpu.memory_space<vmem>>, vector<256x128xf32>
    %28 = arith.mulf %27, %26 : vector<256x128xf32>
    %29 = arith.addf %22, %28 : vector<256x128xf32>
    %30 = arith.truncf %29 : vector<256x128xf32> to vector<256x128xbf16>
    %c0_20 = arith.constant 0 : index
    %c0_21 = arith.constant 0 : index
    %31 = vector.load %arg9[%c0_20, %c0_21] : memref<128x128xbf16, #tpu.memory_space<vmem>>, vector<128x128xbf16>
    %cst_22 = arith.constant dense<0.000000e+00> : vector<256x128xf32>
    %32 = tpu.matmul %30, %31, %cst_22 {dimension_numbers = #tpu.dot_dimension_numbers<[1], [0], [0], [1], [0, 0, 1, 1], [], []>} : vector<256x128xbf16>, vector<128x128xbf16>, vector<256x128xf32> -> vector<256x128xf32>
    %c0_23 = arith.constant 0 : index
    %c0_24 = arith.constant 0 : index
    %33 = vector.load %arg10[%c0_23, %c0_24] : memref<1x128xf32, #tpu.memory_space<vmem>>, vector<1x128xf32>
    %34 = vector.broadcast %33 : vector<1x128xf32> to vector<256x128xf32>
    %35 = arith.addf %32, %34 : vector<256x128xf32>
    %cst_25 = arith.constant 0.000000e+00 : f32
    %36 = vector.broadcast %cst_25 : f32 to vector<256x128xf32>
    %37 = arith.maximumf %35, %36 : vector<256x128xf32>
    %38 = arith.truncf %37 : vector<256x128xf32> to vector<256x128xbf16>
    %c0_26 = arith.constant 0 : index
    %c0_27 = arith.constant 0 : index
    %39 = vector.load %arg11[%c0_26, %c0_27] : memref<128x128xbf16, #tpu.memory_space<vmem>>, vector<128x128xbf16>
    %cst_28 = arith.constant dense<0.000000e+00> : vector<256x128xf32>
    %40 = tpu.matmul %38, %39, %cst_28 {dimension_numbers = #tpu.dot_dimension_numbers<[1], [0], [0], [1], [0, 0, 1, 1], [], []>} : vector<256x128xbf16>, vector<128x128xbf16>, vector<256x128xf32> -> vector<256x128xf32>
    %c0_29 = arith.constant 0 : index
    %c0_30 = arith.constant 0 : index
    %41 = vector.load %arg12[%c0_29, %c0_30] : memref<1x128xf32, #tpu.memory_space<vmem>>, vector<1x128xf32>
    %42 = vector.broadcast %41 : vector<1x128xf32> to vector<256x128xf32>
    %43 = arith.addf %40, %42 : vector<256x128xf32>
    %cst_31 = arith.constant 0.000000e+00 : f32
    %44 = vector.broadcast %cst_31 : f32 to vector<256x128xf32>
    %45 = arith.maximumf %43, %44 : vector<256x128xf32>
    %46 = arith.truncf %45 : vector<256x128xf32> to vector<256x128xbf16>
    %c0_32 = arith.constant 0 : index
    %c0_33 = arith.constant 0 : index
    %47 = vector.load %arg13[%c0_32, %c0_33] : memref<128x128xbf16, #tpu.memory_space<vmem>>, vector<128x128xbf16>
    %cst_34 = arith.constant dense<0.000000e+00> : vector<256x128xf32>
    %48 = tpu.matmul %46, %47, %cst_34 {dimension_numbers = #tpu.dot_dimension_numbers<[1], [0], [0], [1], [0, 0, 1, 1], [], []>} : vector<256x128xbf16>, vector<128x128xbf16>, vector<256x128xf32> -> vector<256x128xf32>
    %c0_35 = arith.constant 0 : index
    %c0_36 = arith.constant 0 : index
    %49 = vector.load %arg14[%c0_35, %c0_36] : memref<1x128xf32, #tpu.memory_space<vmem>>, vector<1x128xf32>
    %50 = vector.broadcast %49 : vector<1x128xf32> to vector<256x128xf32>
    %51 = arith.addf %48, %50 : vector<256x128xf32>
    %c0_37 = arith.constant 0 : index
    %c0_38 = arith.constant 0 : index
    %52 = vector.load %arg15[%c0_37, %c0_38] : memref<256x128xf32, #tpu.memory_space<vmem>>, vector<256x128xf32>
    tpu.vector_store %arg15[%c0_37, %c0_38], %51 {strides = array<i32>} : memref<256x128xf32, #tpu.memory_space<vmem>>, vector<256x128xf32>,
    %c0_39 = arith.constant 0 : index
    %c0_40 = arith.constant 0 : index
    %53 = vector.load %arg16[%c0_39, %c0_40] : memref<256x256xf32, #tpu.memory_space<vmem>>, vector<256x256xf32>
    tpu.vector_store %arg16[%c0_39, %c0_40], %21 {strides = array<i32>} : memref<256x256xf32, #tpu.memory_space<vmem>>, vector<256x256xf32>,
    return
  }
  func.func @transform_0(%arg0: i32) -> (i32, i32) {
    %c0_i32 = arith.constant 0 : i32
    %c0_i32_0 = arith.constant 0 : i32
    return %arg0, %c0_i32 : i32, i32
  }
  func.func @transform_1(%arg0: i32) -> (i32, i32) {
    %c0_i32 = arith.constant 0 : i32
    %c0_i32_0 = arith.constant 0 : i32
    return %arg0, %c0_i32 : i32, i32
  }
  func.func @transform_2(%arg0: i32) -> (i32, i32) {
    %c0_i32 = arith.constant 0 : i32
    %c0_i32_0 = arith.constant 0 : i32
    %c0_i32_1 = arith.constant 0 : i32
    return %c0_i32, %c0_i32_0 : i32, i32
  }
  func.func @transform_3(%arg0: i32) -> (i32, i32) {
    %c0_i32 = arith.constant 0 : i32
    %c0_i32_0 = arith.constant 0 : i32
    %c0_i32_1 = arith.constant 0 : i32
    return %c0_i32, %c0_i32_0 : i32, i32
  }
  func.func @transform_4(%arg0: i32) -> (i32, i32) {
    %c0_i32 = arith.constant 0 : i32
    %c0_i32_0 = arith.constant 0 : i32
    %c0_i32_1 = arith.constant 0 : i32
    return %c0_i32, %c0_i32_0 : i32, i32
  }
  func.func @transform_5(%arg0: i32) -> (i32, i32) {
    %c0_i32 = arith.constant 0 : i32
    %c0_i32_0 = arith.constant 0 : i32
    %c0_i32_1 = arith.constant 0 : i32
    return %c0_i32, %c0_i32_0 : i32, i32
  }
  func.func @transform_6(%arg0: i32) -> (i32, i32) {
    %c0_i32 = arith.constant 0 : i32
    %c0_i32_0 = arith.constant 0 : i32
    %c0_i32_1 = arith.constant 0 : i32
    return %c0_i32, %c0_i32_0 : i32, i32
  }
  func.func @transform_7(%arg0: i32) -> (i32, i32) {
    %c0_i32 = arith.constant 0 : i32
    %c0_i32_0 = arith.constant 0 : i32
    %c0_i32_1 = arith.constant 0 : i32
    return %c0_i32, %c0_i32_0 : i32, i32
  }
  func.func @transform_8(%arg0: i32) -> (i32, i32) {
    %c0_i32 = arith.constant 0 : i32
    %c0_i32_0 = arith.constant 0 : i32
    %c0_i32_1 = arith.constant 0 : i32
    return %c0_i32, %c0_i32_0 : i32, i32
  }
  func.func @transform_9(%arg0: i32) -> (i32, i32) {
    %c0_i32 = arith.constant 0 : i32
    %c0_i32_0 = arith.constant 0 : i32
    %c0_i32_1 = arith.constant 0 : i32
    return %c0_i32, %c0_i32_0 : i32, i32
  }
  func.func @transform_10(%arg0: i32) -> (i32, i32) {
    %c0_i32 = arith.constant 0 : i32
    %c0_i32_0 = arith.constant 0 : i32
    %c0_i32_1 = arith.constant 0 : i32
    return %c0_i32, %c0_i32_0 : i32, i32
  }
  func.func @transform_11(%arg0: i32) -> (i32, i32) {
    %c0_i32 = arith.constant 0 : i32
    %c0_i32_0 = arith.constant 0 : i32
    %c0_i32_1 = arith.constant 0 : i32
    return %c0_i32, %c0_i32_0 : i32, i32
  }
  func.func @transform_12(%arg0: i32) -> (i32, i32) {
    %c0_i32 = arith.constant 0 : i32
    %c0_i32_0 = arith.constant 0 : i32
    %c0_i32_1 = arith.constant 0 : i32
    return %c0_i32, %c0_i32_0 : i32, i32
  }
  func.func @transform_13(%arg0: i32) -> (i32, i32) {
    %c0_i32 = arith.constant 0 : i32
    %c0_i32_0 = arith.constant 0 : i32
    %c0_i32_1 = arith.constant 0 : i32
    return %c0_i32, %c0_i32_0 : i32, i32
  }
  func.func @transform_14(%arg0: i32) -> (i32, i32) {
    %c0_i32 = arith.constant 0 : i32
    %c0_i32_0 = arith.constant 0 : i32
    return %arg0, %c0_i32 : i32, i32
  }
  func.func @transform_15(%arg0: i32) -> (i32, i32) {
    %c0_i32 = arith.constant 0 : i32
    %c0_i32_0 = arith.constant 0 : i32
    return %arg0, %c0_i32 : i32, i32
  }
}

</mosaic_0001>

<bundles_post_ra>
// kernel: tpu_custom_call.1
= control target key start
LH: loop header
LB: loop body
LE: loop exit
PB: predicated region body
PF: predicated region fallthrough
CT: control target
= control target key end

     0   :  { %21 = vsyncpa [#allocation3], 0  ;;  %s3662_s0 = inlined_call_operand.hbm [shape: bf16[256,128], index: 0, kind: input, shape index: {}]   ;;  %s3663_s1 = inlined_call_operand.hbm [shape: f32[256,128], index: 1, kind: input, shape index: {}]   ;;  %s3664_s2 = inlined_call_operand.hbm [shape: bf16[128,128], index: 2, kind: input, shape index: {}]   ;;  %s3665_s3 = inlined_call_operand.vmem [shape: f32[1,128], index: 3, kind: input, shape index: {}]   ;;  %s3666_s4 = inlined_call_operand.hbm [shape: bf16[128,128], index: 4, kind: input, shape index: {}]   ;;  %s3667_s5 = inlined_call_operand.vmem [shape: f32[1,128], index: 5, kind: input, shape index: {}]   ;;  %s3668_s6 = inlined_call_operand.hbm [shape: bf16[128,256], index: 6, kind: input, shape index: {}]   ;;  %s3669_s7 = inlined_call_operand.vmem [shape: f32[1,256], index: 7, kind: input, shape index: {}]   ;;  %s3670_s8 = inlined_call_operand.hbm [shape: bf16[128,128], index: 8, kind: input, shape index: {}]   ;;  %s3671_s9 = inlined_call_operand.vmem [shape: f32[1,128], index: 9, kind: input, shape index: {}]   ;;  %s3672_s10 = inlined_call_operand.hbm [shape: bf16[128,128], index: 10, kind: input, shape index: {}]   ;;  %s3673_s11 = inlined_call_operand.vmem [shape: f32[1,128], index: 11, kind: input, shape index: {}]   ;;  %s3674_s12 = inlined_call_operand.hbm [shape: bf16[128,128], index: 12, kind: input, shape index: {}]   ;;  %s3675_s13 = inlined_call_operand.vmem [shape: f32[1,128], index: 13, kind: input, shape index: {}]   ;;  %s3676_s14 = inlined_call_operand.hbm [shape: f32[256,128], index: 14, kind: output, shape index: {0}]   ;;  %s3677_s15 = inlined_call_operand.hbm [shape: f32[256,256], index: 15, kind: output, shape index: {1}]  }
   0x1   :  { %22 = vsyncpa [#allocation6], 0 }
   0x2   :  { %23 = vsyncpa [#allocation9], 0 }
   0x3   :  { %24 = vsyncpa [#allocation12], 0 }
   0x4   :  { %25 = vsyncpa [#allocation15], 0 }
   0x5   :  { %26 = vsyncpa [#allocation4], 0 }
   0x6   :  { %27 = vsyncpa [#allocation18], 0  ;;  %s3111_s18 = smov [#allocation5]  }
   0x7   :  { %s45_s19 = sshll.u32 %s3111_s18, 4  ;;  %s46_s19 = int_to_ptr.vmem [resolvable:$true] %s45_s19 }
   0x8   :  { %s2905_s20 = scalar_lea.vmem %s46_s19, 4096  ;;  %p2910_p1 = scmp.lt.s32.totalorder %s46_s19, %s46_s19 }
   0x9   :  { %p2906_p0 = scmp.ne.s32.totalorder %s46_s19, %s2905_s20  ;;  %p2911_p2 = scmp.lt.s32.totalorder %s2905_s20, %s2905_s20 }
   0xb   :  { %p2912_p3 = por %p2911_p2, %p2910_p1 }
   0xd   :  { %p2913_p4 = pnand %p2912_p3, %p2906_p0 }
   0xf   :  { %2916 = shalt.err (!%p2913_p4)
}
  0x10   :  { %s3112_s21 = smov 128   ;;  %s3113_s22 = smov 8  }
  0x11   :  { %51 = dma.hbm_to_vmem [thread:$0]  %s3663_s1, 4096, %s46_s19, [#allocation6], %s3112_s21, %s3112_s21, %s3113_s22  }
  0x12   :  { %s3114_s25 = smov [#allocation8]   ;;  %s3115_s27 = smov [#allocation11]  }
  0x13   :  { %s71_s26 = sshll.u32 %s3114_s25, 4  ;;  %s99_s28 = sshll.u32 %s3115_s27, 4  ;;  %s72_s26 = int_to_ptr.vmem [resolvable:$true] %s71_s26  ;;  %s100_s28 = int_to_ptr.vmem [resolvable:$true] %s99_s28 }
  0x14   :  { %s2925_s29 = scalar_lea.vmem %s72_s26, 1024  ;;  %p2930_p6 = scmp.lt.s32.totalorder %s72_s26, %s72_s26 }
  0x15   :  { %p2926_p5 = scmp.ne.s32.totalorder %s72_s26, %s2925_s29  ;;  %p2931_p7 = scmp.lt.s32.totalorder %s2925_s29, %s2925_s29 }
  0x17   :  { %p2932_p8 = por %p2931_p7, %p2930_p6 }
  0x19   :  { %p2933_p9 = pnand %p2932_p8, %p2926_p5 }
  0x1b   :  { %2936 = shalt.err (!%p2933_p9)
}
  0x1c   :  { %s3116_s30 = smov 64   ;;  %s3117_s16 = smov 4  }
  0x1d   :  { %77 = dma.hbm_to_vmem [thread:$0]  %s3666_s4, 1024, %s72_s26, [#allocation9], %s3116_s30, %s3116_s30, %s3117_s16  }
  0x1e   :  { %s2945_s1 = scalar_lea.vmem %s100_s28, 1024  ;;  %p2950_p11 = scmp.lt.s32.totalorder %s100_s28, %s100_s28 }
  0x1f   :  { %p2946_p10 = scmp.ne.s32.totalorder %s100_s28, %s2945_s1  ;;  %p2951_p12 = scmp.lt.s32.totalorder %s2945_s1, %s2945_s1 }
  0x21   :  { %p2952_p13 = por %p2951_p12, %p2950_p11 }
  0x23   :  { %p2953_p0 = pnand %p2952_p13, %p2946_p10 }
  0x25   :  { %2956 = shalt.err (!%p2953_p0)
}
  0x26   :  { %105 = dma.hbm_to_vmem [thread:$0]  %s3670_s8, 1024, %s100_s28, [#allocation12], %s3116_s30, %s3116_s30, %s3117_s16  }
  0x27   :  { %s3118_s23 = smov [#allocation2]   ;;  %s3119_s25 = smov [#allocation7]  }
  0x28   :  { %s33_s24 = sshll.u32 %s3118_s23, 4  ;;  %s57_s4 = sshll.u32 %s3119_s25, 4  ;;  %s34_s24 = int_to_ptr.vmem [resolvable:$true] %s33_s24  ;;  %s58_s4 = int_to_ptr.vmem [resolvable:$true] %s57_s4 }
  0x29   :  { %s2965_s26 = scalar_lea.vmem %s34_s24, 2048  ;;  %p2970_p2 = scmp.lt.s32.totalorder %s34_s24, %s34_s24 }
  0x2a   :  { %p2966_p1 = scmp.ne.s32.totalorder %s34_s24, %s2965_s26  ;;  %p2971_p3 = scmp.lt.s32.totalorder %s2965_s26, %s2965_s26 }
  0x2c   :  { %p2972_p4 = por %p2971_p3, %p2970_p2 }
  0x2e   :  { %p2973_p5 = pnand %p2972_p4, %p2966_p1 }
  0x30   :  { %2976 = shalt.err (!%p2973_p5)
}
  0x31   :  { %39 = dma.hbm_to_vmem [thread:$0]  %s3662_s0, 2048, %s34_s24, [#allocation3], %s3116_s30, %s3116_s30, %s3117_s16  }
  0x32   :  { %s2985_s8 = scalar_lea.vmem %s58_s4, 1024  ;;  %p2990_p7 = scmp.lt.s32.totalorder %s58_s4, %s58_s4 }
  0x33   :  { %p2986_p6 = scmp.ne.s32.totalorder %s58_s4, %s2985_s8  ;;  %p2991_p8 = scmp.lt.s32.totalorder %s2985_s8, %s2985_s8 }
  0x35   :  { %p2992_p9 = por %p2991_p8, %p2990_p7 }
  0x37   :  { %p2993_p10 = pnand %p2992_p9, %p2986_p6 }
  0x39   :  { %2996 = shalt.err (!%p2993_p10)
}
  0x3a   :  { %63 = dma.hbm_to_vmem [thread:$0]  %s3664_s2, 1024, %s58_s4, [#allocation6], %s3116_s30, %s3116_s30, %s3117_s16  }
  0x3b   :  { %s3120_s18 = smov [#allocation10]   ;;  %s3121_s19 = smov [#allocation13]  }
  0x3c   :  { %s85_s1 = sshll.u32 %s3120_s18, 4  ;;  %s113_s0 = sshll.u32 %s3121_s19, 4  ;;  %s86_s1 = int_to_ptr.vmem [resolvable:$true] %s85_s1  ;;  %s114_s0 = int_to_ptr.vmem [resolvable:$true] %s113_s0 }
  0x3d   :  { %s3005_s20 = scalar_lea.vmem %s86_s1, 2048  ;;  %p3010_p12 = scmp.lt.s32.totalorder %s86_s1, %s86_s1 }
  0x3e   :  { %p3006_p11 = scmp.ne.s32.totalorder %s86_s1, %s3005_s20  ;;  %p3011_p13 = scmp.lt.s32.totalorder %s3005_s20, %s3005_s20 }
  0x40   :  { %p3012_p0 = por %p3011_p13, %p3010_p12 }
  0x42   :  { %p3013_p1 = pnand %p3012_p0, %p3006_p11 }
  0x44   :  { %3016 = shalt.err (!%p3013_p1)
}
  0x45   :  { %91 = dma.hbm_to_vmem [thread:$0]  %s3668_s6, 2048, %s86_s1, [#allocation9], %s3112_s21, %s3112_s21, %s3113_s22  }
  0x46   :  { %s3025_s2 = scalar_lea.vmem %s114_s0, 1024  ;;  %p3030_p3 = scmp.lt.s32.totalorder %s114_s0, %s114_s0 }
  0x47   :  { %p3026_p2 = scmp.ne.s32.totalorder %s114_s0, %s3025_s2  ;;  %p3031_p4 = scmp.lt.s32.totalorder %s3025_s2, %s3025_s2 }
  0x49   :  { %p3032_p5 = por %p3031_p4, %p3030_p3 }
  0x4b   :  { %p3033_p6 = pnand %p3032_p5, %p3026_p2 }
  0x4d   :  { %3036 = shalt.err (!%p3033_p6)
}
  0x4e   :  { %119 = dma.hbm_to_vmem [thread:$0]  %s3672_s10, 1024, %s114_s0, [#allocation12], %s3116_s30, %s3116_s30, %s3117_s16  }
  0x4f   :  { %s3122_s26 = smov [#allocation14]  }
  0x50   :  { %s127_s27 = sshll.u32 %s3122_s26, 4  ;;  %s128_s27 = int_to_ptr.vmem [resolvable:$true] %s127_s27 }
  0x51   :  { %s3045_s29 = scalar_lea.vmem %s128_s27, 1024  ;;  %p3050_p8 = scmp.lt.s32.totalorder %s128_s27, %s128_s27 }
  0x52   :  { %p3046_p7 = scmp.ne.s32.totalorder %s128_s27, %s3045_s29  ;;  %p3051_p9 = scmp.lt.s32.totalorder %s3045_s29, %s3045_s29 }
  0x54   :  { %p3052_p10 = por %p3051_p9, %p3050_p8 }
  0x56   :  { %p3053_p11 = pnand %p3052_p10, %p3046_p7 }
  0x58   :  { %3056 = shalt.err (!%p3053_p11)
}
  0x59   :  { %133 = dma.hbm_to_vmem [thread:$0]  %s3674_s12, 1024, %s128_s27, [#allocation15], %s3116_s30, %s3116_s30, %s3117_s16  }
  0x5a   :  { %3097 = dma.done.wait [#allocation3], 2048  }
  0x5b   :  { %3098 = vsyncadd [#allocation3], 4294965248 }
  0x5c   :  { %3099 = dma.done.wait [#allocation6], 5120  }
  0x5d   :  { %3100 = vsyncadd [#allocation6], 4294962176 }
  0x5e   :  { %3101 = dma.done.wait [#allocation9], 3072  }
  0x5f   :  { %3102 = vsyncadd [#allocation9], 4294964224 }
  0x60   :  { %3103 = dma.done.wait [#allocation12], 2048  }
  0x61   :  { %3104 = vsyncadd [#allocation12], 4294965248 }
  0x62   :  { %3105 = dma.done.wait [#allocation15], 1024  }
  0x63   :  { %3106 = vsyncadd [#allocation15], 4294966272  ;;  %v2753_v0 = vld [vmem:[#allocation7 + $0x38] sm:$0xff]   ;;  %v2754_v1 = vld [vmem:[#allocation7 + $0x30] sm:$0xff]  }
  0x64   :  { %2480 = vmatprep.subr.bf16.mxu0 %v2753_v0  ;;  %2720 = vmatprep.subr.bf16.mxu1 %v2753_v0  ;;  %v2755_v2 = vld [vmem:[#allocation7 + $0x28] sm:$0xff]   ;;  %v2756_v3 = vld [vmem:[#allocation7 + $0x20] sm:$0xff]   ;;  %v2757_v5 = vld [vmem:[#allocation7 + $0x18] sm:$0xff]  }
  0x65   :  { %2481 = vmatpush3.bf16.msra.mxu0 %v2753_v0  ;;  %2728 = vmatpush3.bf16.msra.mxu1 %v2753_v0  ;;  %v2761_v4 = vld [vmem:[#allocation2] sm:$0xff]   ;;  %v2758_v6 = vld [vmem:[#allocation7 + $0x10] sm:$0xff]   ;;  %v2759_v8 = vld [vmem:[#allocation7 + $0x8] sm:$0xff]  }
  0x66   :  { %2482 = vmatprep.subr.bf16.mxu0 %v2754_v1  ;;  %2721 = vmatprep.subr.bf16.mxu1 %v2754_v1  ;;  %v2769_v7 = vld [vmem:[#allocation2 + $0x40] sm:$0xff]   ;;  %v2762_v10 = vld [vmem:[#allocation2 + $0x8] sm:$0xff]   ;;  %v2777_v12 = vld [vmem:[#allocation8 + $0x38] sm:$0xff]  }
  0x67   :  { %2496 = vmatprep.mubr.bf16.mxu0 %v2761_v4  ;;  %2512 = vmatprep.mubr.bf16.mxu1 %v2769_v7  ;;  %v2760_v9 = vld [vmem:[#allocation7] sm:$0xff]   ;;  %v2770_v11 = vld [vmem:[#allocation2 + $0x48] sm:$0xff]   ;;  %v2763_v13 = vld [vmem:[#allocation2 + $0x10] sm:$0xff]  }
  0x68   :  { %v2771_v14 = vld [vmem:[#allocation2 + $0x50] sm:$0xff]   ;;  %v2779_v16 = vld [vmem:[#allocation8 + $0x28] sm:$0xff]   ;;  %v2764_v17 = vld [vmem:[#allocation2 + $0x18] sm:$0xff]  }
  0x69   :  { %2483 = vmatpush3.bf16.msra.mxu0 %v2754_v1  ;;  %2729 = vmatpush3.bf16.msra.mxu1 %v2754_v1  ;;  %v2778_v15 = vld [vmem:[#allocation8 + $0x30] sm:$0xff]   ;;  %v2772_v18 = vld [vmem:[#allocation2 + $0x58] sm:$0xff]   ;;  %v2765_v19 = vld [vmem:[#allocation2 + $0x20] sm:$0xff]  }
  0x6a   :  { %2484 = vmatprep.subr.bf16.mxu0 %v2755_v2  ;;  %2722 = vmatprep.subr.bf16.mxu1 %v2755_v2  ;;  %v2773_v20 = vld [vmem:[#allocation2 + $0x60] sm:$0xff]   ;;  %v2781_v22 = vld [vmem:[#allocation8 + $0x18] sm:$0xff]   ;;  %v2766_v23 = vld [vmem:[#allocation2 + $0x28] sm:$0xff]  }
  0x6b   :  { %v2780_v21 = vld [vmem:[#allocation8 + $0x20] sm:$0xff]   ;;  %v2774_v24 = vld [vmem:[#allocation2 + $0x68] sm:$0xff]   ;;  %v2767_v25 = vld [vmem:[#allocation2 + $0x30] sm:$0xff]  }
  0x6c   :  { %v2775_v26 = vld [vmem:[#allocation2 + $0x70] sm:$0xff]   ;;  %v2768_v27 = vld [vmem:[#allocation2 + $0x38] sm:$0xff]   ;;  %v2783_v30 = vld [vmem:[#allocation8 + $0x8] sm:$0xff]  }
  0x6d   :  { %2485 = vmatpush3.bf16.msra.mxu0 %v2755_v2  ;;  %2730 = vmatpush3.bf16.msra.mxu1 %v2755_v2  ;;  %v2776_v28 = vld [vmem:[#allocation2 + $0x78] sm:$0xff]   ;;  %v2782_v29 = vld [vmem:[#allocation8 + $0x10] sm:$0xff]   ;;  %v2784_v31 = vld [vmem:[#allocation8] sm:$0xff]  }
  0x6e   :  { %2486 = vmatprep.subr.bf16.mxu0 %v2756_v3  ;;  %2723 = vmatprep.subr.bf16.mxu1 %v2756_v3  ;;  %v2785_v32 = vld [vmem:[#allocation10 + $0x70] ss:$8 sps:$4 sm:$0xff]   ;;  %v2787_v33 = vld [vmem:[#allocation10 + $0x74] ss:$8 sps:$4 sm:$0xff]   ;;  %v2790_v34 = vld [vmem:[#allocation10 + $0x64] ss:$8 sps:$4 sm:$0xff]  }
  0x6f   :  { %v2788_v35 = vld [vmem:[#allocation10 + $0x60] ss:$8 sps:$4 sm:$0xff]   ;;  %v2793_v36 = vld [vmem:[#allocation10 + $0x54] ss:$8 sps:$4 sm:$0xff]   ;;  %v2791_v37 = vld [vmem:[#allocation10 + $0x50] ss:$8 sps:$4 sm:$0xff]  }
  0x70   :  { %v2796_v38 = vld [vmem:[#allocation10 + $0x44] ss:$8 sps:$4 sm:$0xff]   ;;  %v2794_v39 = vld [vmem:[#allocation10 + $0x40] ss:$8 sps:$4 sm:$0xff]   ;;  %v2799_v40 = vld [vmem:[#allocation10 + $0x34] ss:$8 sps:$4 sm:$0xff]  }
  0x71   :  { %2487 = vmatpush3.bf16.msra.mxu0 %v2756_v3  ;;  %2731 = vmatpush3.bf16.msra.mxu1 %v2756_v3  ;;  %v2797_v41 = vld [vmem:[#allocation10 + $0x30] ss:$8 sps:$4 sm:$0xff]   ;;  %v3261_v46 = vld [vmem:[%s3665_s3] ss:$0 sm:$0xff] }
  0x72   :  { %2488 = vmatprep.subr.bf16.mxu0 %v2757_v5  ;;  %2724 = vmatprep.subr.bf16.mxu1 %v2757_v5 }
  0x75   :  { %2489 = vmatpush3.bf16.msra.mxu0 %v2757_v5  ;;  %2732 = vmatpush3.bf16.msra.mxu1 %v2757_v5 }
  0x76   :  { %2490 = vmatprep.subr.bf16.mxu0 %v2758_v6  ;;  %2725 = vmatprep.subr.bf16.mxu1 %v2758_v6 }
  0x79   :  { %2491 = vmatpush3.bf16.msra.mxu0 %v2758_v6  ;;  %2733 = vmatpush3.bf16.msra.mxu1 %v2758_v6 }
  0x7a   :  { %2492 = vmatprep.subr.bf16.mxu0 %v2759_v8  ;;  %2726 = vmatprep.subr.bf16.mxu1 %v2759_v8 }
  0x7d   :  { %2493 = vmatpush3.bf16.msra.mxu0 %v2759_v8  ;;  %2734 = vmatpush3.bf16.msra.mxu1 %v2759_v8 }
  0x7e   :  { %2494 = vmatprep.subr.bf16.mxu0 %v2760_v9  ;;  %2727 = vmatprep.subr.bf16.mxu1 %v2760_v9 }
  0x81   :  { %2495 = vmatpush3.bf16.msra.mxu0 %v2760_v9  ;;  %2735 = vmatpush3.bf16.msra.mxu1 %v2760_v9 }
  0x82   :  { %2528 = vmatprep.subr.bf16.mxu1 %v2777_v12  ;;  %957 = vmatprep.subr.bf16.mxu0 %v2787_v33 }
  0x84   :  { %2497 = vmatmul.mubr.bf16.vlgmr.msra.gmra.mxu0 %v2762_v10  ;;  %2513 = vmatmul.mubr.bf16.vlgmr.msra.gmra.mxu1 %v2770_v11 }
  0x85   :  { %2500 = vmatprep.mubr.bf16.mxu0 %v2763_v13  ;;  %2516 = vmatprep.mubr.bf16.mxu1 %v2771_v14 }
  0x86   :  { %2529 = vmatpush3.bf16.msra.mxu1 %v2777_v12  ;;  %958 = vmatpush1.bf16.msra.mxu0 %v2785_v32 }
  0x87   :  { %2530 = vmatprep.subr.bf16.mxu1 %v2778_v15  ;;  %959 = vmatprep.subr.bf16.mxu0 %v2790_v34 }
  0x8a   :  { %2531 = vmatpush3.bf16.msra.mxu1 %v2778_v15  ;;  %960 = vmatpush1.bf16.msra.mxu0 %v2788_v35 }
  0x8b   :  { %2532 = vmatprep.subr.bf16.mxu1 %v2779_v16  ;;  %961 = vmatprep.subr.bf16.mxu0 %v2793_v36 }
  0x8c   :  { %2501 = vmatmul.mubr.bf16.gmra.mxu0 %v2764_v17  ;;  %2517 = vmatmul.mubr.bf16.gmra.mxu1 %v2772_v18 }
  0x8d   :  { %2504 = vmatprep.mubr.bf16.mxu0 %v2765_v19  ;;  %2520 = vmatprep.mubr.bf16.mxu1 %v2773_v20 }
  0x8e   :  { %2533 = vmatpush3.bf16.msra.mxu1 %v2779_v16  ;;  %962 = vmatpush1.bf16.msra.mxu0 %v2791_v37 }
  0x8f   :  { %2534 = vmatprep.subr.bf16.mxu1 %v2780_v21  ;;  %963 = vmatprep.subr.bf16.mxu0 %v2796_v38 }
  0x92   :  { %2535 = vmatpush3.bf16.msra.mxu1 %v2780_v21  ;;  %964 = vmatpush1.bf16.msra.mxu0 %v2794_v39 }
  0x93   :  { %2536 = vmatprep.subr.bf16.mxu1 %v2781_v22  ;;  %965 = vmatprep.subr.bf16.mxu0 %v2799_v40 }
  0x94   :  { %2505 = vmatmul.mubr.bf16.gmra.mxu0 %v2766_v23  ;;  %2521 = vmatmul.mubr.bf16.gmra.mxu1 %v2774_v24 }
  0x95   :  { %2508 = vmatprep.mubr.bf16.mxu0 %v2767_v25  ;;  %2524 = vmatprep.mubr.bf16.mxu1 %v2775_v26 }
  0x96   :  { %2537 = vmatpush3.bf16.msra.mxu1 %v2781_v22  ;;  %966 = vmatpush1.bf16.msra.mxu0 %v2797_v41 }
  0x97   :  { %2538 = vmatprep.subr.bf16.mxu1 %v2782_v29 }
  0x9a   :  { %2539 = vmatpush3.bf16.msra.mxu1 %v2782_v29 }
  0x9b   :  { %2540 = vmatprep.subr.bf16.mxu1 %v2783_v30 }
  0x9c   :  { %2509 = vmatmul.mubr.bf16.gmra.mxu0 %v2768_v27  ;;  %2525 = vmatmul.mubr.bf16.gmra.mxu1 %v2776_v28 }
  0x9e   :  { %2541 = vmatpush3.bf16.msra.mxu1 %v2783_v30 }
  0x9f   :  { %2542 = vmatprep.subr.bf16.mxu1 %v2784_v31 }
  0xa2   :  { %2543 = vmatpush3.bf16.msra.mxu1 %v2784_v31 }
 0x144   :  { %v2498_v42 = vpop.f32.mrf.mxu0  ;;  %v3256_v43 = vpop.f32.mrf.mxu1 }
 0x145   :  { %v403_v51 = vadd.f32 %v2498_v42, %v3261_v46 }
 0x146   :  { %v394_v44 = vpop.f32.mrf.mxu0  ;;  %v458_v45 = vpop.f32.mrf.mxu1 }
 0x147   :  { %v395_v49 = vadd.f32 %v3261_v46, %v394_v44  ;;  %v523_v60 = vmax.f32 %v403_v51, 0.0  ;;  %v459_v32 = vadd.f32 %v3261_v46, %v458_v45 }
 0x148   :  { %v2499_v47 = vpop.f32.mrf.mxu0  ;;  %v3263_v48 = vpop.f32.mrf.mxu1 }
 0x149   :  { %v406_v50 = vadd.f32 %v2499_v47, %v3261_v46  ;;  %v521_v58 = vmax.f32 %v395_v49, 0.0  ;;  %v537_v41 = vmax.f32 %v459_v32, 0.0  ;;  %v2808_v32 = vld [vmem:[#allocation10 + $0x4] ss:$8 sps:$4 sm:$0xff]  }
 0x14a   :  { %v397_v52 = vpop.f32.mrf.mxu0  ;;  %v461_v53 = vpop.f32.mrf.mxu1 }
 0x14b   :  { %v398_v54 = vadd.f32 %v3261_v46, %v397_v52  ;;  %v524_v55 = vmax.f32 %v406_v50, 0.0  ;;  %v462_v36 = vadd.f32 %v3261_v46, %v461_v53  ;;  %v467_v52 = vadd.f32 %v3256_v43, %v3261_v46 }
 0x14c   :  { %v2502_v56 = vpop.f32.mrf.mxu0  ;;  %v3269_v57 = vpop.f32.mrf.mxu1  ;;  %v470_v53 = vadd.f32 %v3263_v48, %v3261_v46 }
 0x14d   :  { %v522_v59 = vmax.f32 %v398_v54, 0.0  ;;  %v419_v61 = vadd.f32 %v2502_v56, %v3261_v46  ;;  %v554_v1 = vpack.c.bf16 %v524_v55, %v523_v60  ;;  %v538_v45 = vmax.f32 %v462_v36, 0.0  ;;  %v3306_v36 = vld [vmem:[%s3667_s5] ss:$0 sm:$0xff] }
 0x14e   :  { %v410_v62 = vpop.f32.mrf.mxu0  ;;  %v474_v3 = vpop.f32.mrf.mxu1  ;;  %v483_v48 = vadd.f32 %v3269_v57, %v3261_v46 }
 0x14f   :  { %v553_v63 = vpack.c.bf16 %v522_v59, %v521_v58  ;;  %v411_v0 = vadd.f32 %v3261_v46, %v410_v62  ;;  %v527_v5 = vmax.f32 %v419_v61, 0.0  ;;  %v561_v56 = vpack.c.bf16 %v538_v45, %v537_v41 }
 0x150   :  { %v2503_v2 = vpop.f32.mrf.mxu0  ;;  %v2519_v11 = vpop.f32.mrf.mxu1  ;;  %v475_v58 = vadd.f32 %v3261_v46, %v474_v3  ;;  %v539_v61 = vmax.f32 %v467_v52, 0.0  ;;  %v540_v62 = vmax.f32 %v470_v53, 0.0 }
 0x151   :  { %v422_v4 = vadd.f32 %v2503_v2, %v3261_v46  ;;  %2544 = vmatprep.mubr.bf16.mxu1 %v553_v63  ;;  %v525_v7 = vmax.f32 %v411_v0, 0.0  ;;  %v486_v2 = vadd.f32 %v2519_v11, %v3261_v46 }
 0x152   :  { %v413_v6 = vpop.f32.mrf.mxu0  ;;  %2545 = vmatmul.mubr.bf16.vlgmr.msra.gmra.mxu1 %v554_v1  ;;  %v477_v19 = vpop.f32.mrf.mxu1  ;;  %v541_v63 = vmax.f32 %v475_v58, 0.0  ;;  %v562_v43 = vpack.c.bf16 %v540_v62, %v539_v61 }
 0x153   :  { %v528_v8 = vmax.f32 %v422_v4, 0.0  ;;  %v414_v9 = vadd.f32 %v3261_v46, %v413_v6  ;;  %v478_v59 = vadd.f32 %v3261_v46, %v477_v19 }
 0x154   :  { %v2506_v10 = vpop.f32.mrf.mxu0  ;;  %v2522_v23 = vpop.f32.mrf.mxu1 }
 0x155   :  { %v526_v12 = vmax.f32 %v414_v9, 0.0  ;;  %v556_v13 = vpack.c.bf16 %v528_v8, %v527_v5  ;;  %v435_v14 = vadd.f32 %v2506_v10, %v3261_v46  ;;  %v542_v0 = vmax.f32 %v478_v59, 0.0 }
 0x156   :  { %v426_v15 = vpop.f32.mrf.mxu0  ;;  %v490_v33 = vpop.f32.mrf.mxu1  ;;  %v544_v8 = vmax.f32 %v486_v2, 0.0 }
 0x157   :  { %v555_v16 = vpack.c.bf16 %v526_v12, %v525_v7  ;;  %v427_v17 = vadd.f32 %v3261_v46, %v426_v15  ;;  %v531_v21 = vmax.f32 %v435_v14, 0.0  ;;  %v563_v4 = vpack.c.bf16 %v542_v0, %v541_v63 }
 0x158   :  { %v2507_v18 = vpop.f32.mrf.mxu0  ;;  %v2523_v42 = vpop.f32.mrf.mxu1  ;;  %v491_v3 = vadd.f32 %v3261_v46, %v490_v33  ;;  %v543_v7 = vmax.f32 %v483_v48, 0.0  ;;  %v499_v14 = vadd.f32 %v2522_v23, %v3261_v46  ;;  %v2806_v33 = vld [vmem:[#allocation10] ss:$8 sps:$4 sm:$0xff]  }
 0x159   :  { %2548 = vmatprep.mubr.bf16.mxu1 %v555_v16  ;;  %v438_v20 = vadd.f32 %v2507_v18, %v3261_v46  ;;  %v529_v24 = vmax.f32 %v427_v17, 0.0  ;;  %v502_v57 = vadd.f32 %v2523_v42, %v3261_v46 }
 0x15a   :  { %2549 = vmatmul.mubr.bf16.gmra.mxu1 %v556_v13  ;;  %v429_v22 = vpop.f32.mrf.mxu0  ;;  %v493_v54 = vpop.f32.mrf.mxu1  ;;  %v545_v9 = vmax.f32 %v491_v3, 0.0  ;;  %v564_v13 = vpack.c.bf16 %v544_v8, %v543_v7  ;;  %v547_v17 = vmax.f32 %v499_v14, 0.0 }
 0x15b   :  { %v532_v25 = vmax.f32 %v438_v20, 0.0  ;;  %v430_v26 = vadd.f32 %v3261_v46, %v429_v22  ;;  %v494_v5 = vadd.f32 %v3261_v46, %v493_v54  ;;  %v548_v18 = vmax.f32 %v502_v57, 0.0 }
 0x15c   :  { %v2510_v27 = vpop.f32.mrf.mxu0  ;;  %v2526_v60 = vpop.f32.mrf.mxu1 }
 0x15d   :  { %v530_v28 = vmax.f32 %v430_v26, 0.0  ;;  %v558_v29 = vpack.c.bf16 %v532_v25, %v531_v21  ;;  %v451_v30 = vadd.f32 %v2510_v27, %v3261_v46  ;;  %v546_v10 = vmax.f32 %v494_v5, 0.0 }
 0x15e   :  { %v442_v31 = vpop.f32.mrf.mxu0  ;;  %v506_v1 = vpop.f32.mrf.mxu1  ;;  %v566_v21 = vpack.c.bf16 %v548_v18, %v547_v17  ;;  %v515_v22 = vadd.f32 %v2526_v60, %v3261_v46 }
 0x15f   :  { %v557_v34 = vpack.c.bf16 %v530_v28, %v529_v24  ;;  %v443_v35 = vadd.f32 %v3261_v46, %v442_v31  ;;  %v535_v39 = vmax.f32 %v451_v30, 0.0  ;;  %v565_v15 = vpack.c.bf16 %v546_v10, %v545_v9  ;;  %v2802_v28 = vld [vmem:[#allocation10 + $0x24] ss:$8 sps:$4 sm:$0xff]   ;;  %v2805_v30 = vld [vmem:[#allocation10 + $0x14] ss:$8 sps:$4 sm:$0xff]  }
 0x160   :  { %v2511_v37 = vpop.f32.mrf.mxu0  ;;  %v2527_v6 = vpop.f32.mrf.mxu1  ;;  %v507_v11 = vadd.f32 %v3261_v46, %v506_v1  ;;  %v551_v23 = vmax.f32 %v515_v22, 0.0  ;;  %967 = vmatprep.subr.bf16.mxu0 %v2802_v28  ;;  %v2803_v31 = vld [vmem:[#allocation10 + $0x10] ss:$8 sps:$4 sm:$0xff]  }
 0x161   :  { %2552 = vmatprep.mubr.bf16.mxu1 %v557_v34  ;;  %v454_v38 = vadd.f32 %v2511_v37, %v3261_v46  ;;  %v533_v44 = vmax.f32 %v443_v35, 0.0  ;;  %v518_v24 = vadd.f32 %v2527_v6, %v3261_v46 }
 0x162   :  { %2553 = vmatmul.mubr.bf16.gmra.mxu1 %v558_v29  ;;  %v445_v40 = vpop.f32.mrf.mxu0  ;;  %v509_v12 = vpop.f32.mrf.mxu1  ;;  %v549_v19 = vmax.f32 %v507_v11, 0.0  ;;  %v2800_v29 = vld [vmem:[#allocation10 + $0x20] ss:$8 sps:$4 sm:$0xff]  }
 0x163   :  { %v536_v47 = vmax.f32 %v454_v38, 0.0  ;;  %v446_v49 = vadd.f32 %v3261_v46, %v445_v40  ;;  %v510_v16 = vadd.f32 %v3261_v46, %v509_v12  ;;  %v552_v26 = vmax.f32 %v518_v24, 0.0  ;;  %968 = vmatpush1.bf16.msra.mxu0 %v2800_v29 }
 0x164   :  { %969 = vmatprep.subr.bf16.mxu0 %v2805_v30  ;;  %v3123_v46 = vmov 0  }
 0x165   :  { %v534_v50 = vmax.f32 %v446_v49, 0.0  ;;  %v560_v51 = vpack.c.bf16 %v536_v47, %v535_v39  ;;  %v550_v20 = vmax.f32 %v510_v16, 0.0  ;;  %v568_v27 = vpack.c.bf16 %v552_v26, %v551_v23  ;;  %989 = vmatprep.mubr.bf16.mxu0 %v3123_v46 }
 0x167   :  { %v559_v55 = vpack.c.bf16 %v534_v50, %v533_v44  ;;  %v567_v25 = vpack.c.bf16 %v550_v20, %v549_v19  ;;  %970 = vmatpush1.bf16.msra.mxu0 %v2803_v31 }
 0x168   :  { %971 = vmatprep.subr.bf16.mxu0 %v2808_v32 }
 0x169   :  { %2556 = vmatprep.mubr.bf16.mxu1 %v559_v55 }
 0x16a   :  { %2557 = vmatmul.mubr.bf16.gmra.mxu1 %v560_v51 }
 0x16b   :  { %2560 = vmatprep.mubr.bf16.mxu1 %v561_v56  ;;  %972 = vmatpush1.bf16.msra.mxu0 %v2806_v33 }
 0x172   :  { %2561 = vmatmul.mubr.bf16.gmra.mxu1 %v562_v43 }
 0x173   :  { %2564 = vmatprep.mubr.bf16.mxu1 %v563_v4 }
 0x17a   :  { %2565 = vmatmul.mubr.bf16.gmra.mxu1 %v564_v13 }
 0x17b   :  { %2568 = vmatprep.mubr.bf16.mxu1 %v565_v15 }
 0x182   :  { %2569 = vmatmul.mubr.bf16.gmra.mxu1 %v566_v21 }
 0x183   :  { %2572 = vmatprep.mubr.bf16.mxu1 %v567_v25 }
 0x18a   :  { %2573 = vmatmul.mubr.bf16.gmra.mxu1 %v568_v27 }
 0x212   :  { %v2546_v34 = vpop.f32.mrf.mxu1 }
 0x213   :  { %v683_v51 = vadd.f32 %v2546_v34, %v3306_v36 }
 0x214   :  { %v674_v35 = vpop.f32.mrf.mxu1 }
 0x215   :  { %v675_v38 = vadd.f32 %v3306_v36, %v674_v35  ;;  %v803_v54 = vmax.f32 %v683_v51, 0.0 }
 0x216   :  { %v2547_v37 = vpop.f32.mrf.mxu1 }
 0x217   :  { %v801_v42 = vmax.f32 %v675_v38, 0.0  ;;  %v686_v49 = vadd.f32 %v2547_v37, %v3306_v36 }
 0x218   :  { %v677_v39 = vpop.f32.mrf.mxu1 }
 0x219   :  { %v678_v40 = vadd.f32 %v3306_v36, %v677_v39  ;;  %v804_v52 = vmax.f32 %v686_v49, 0.0 }
 0x21a   :  { %v2550_v41 = vpop.f32.mrf.mxu1 }
 0x21b   :  { %v802_v44 = vmax.f32 %v678_v40, 0.0  ;;  %v834_v55 = vpack.c.bf16 %v804_v52, %v803_v54  ;;  %v699_v43 = vadd.f32 %v2550_v41, %v3306_v36 }
 0x21c   :  { %v690_v47 = vpop.f32.mrf.mxu1 }
 0x21d   :  { %v833_v45 = vpack.c.bf16 %v802_v44, %v801_v42  ;;  %v691_v59 = vadd.f32 %v3306_v36, %v690_v47  ;;  %v807_v4 = vmax.f32 %v699_v43, 0.0 }
 0x21e   :  { %v2551_v50 = vpop.f32.mrf.mxu1 }
 0x21f   :  { %990 = vmatmul.mubr.bf16.vlgmr.msra.gmra.mxu0 %v833_v45  ;;  %v805_v62 = vmax.f32 %v691_v59, 0.0  ;;  %v702_v63 = vadd.f32 %v2551_v50, %v3306_v36 }
 0x220   :  { %999 = vmatprep.mubr.bf16.mxu0 %v3123_v46  ;;  %v693_v53 = vpop.f32.mrf.mxu1 }
 0x221   :  { %v694_v56 = vadd.f32 %v3306_v36, %v693_v53  ;;  %v808_v48 = vmax.f32 %v702_v63, 0.0  ;;  %v2809_v53 = vld [vmem:[#allocation11 + $0x38] sm:$0xff]   ;;  %v2811_v63 = vld [vmem:[#allocation11 + $0x28] sm:$0xff]  }
 0x222   :  { %v2554_v58 = vpop.f32.mrf.mxu1  ;;  %2576 = vmatprep.subr.bf16.mxu1 %v2809_v53 }
 0x223   :  { %v806_v60 = vmax.f32 %v694_v56, 0.0  ;;  %v836_v3 = vpack.c.bf16 %v808_v48, %v807_v4  ;;  %v715_v12 = vadd.f32 %v2554_v58, %v3306_v36  ;;  %2577 = vmatpush3.bf16.msra.mxu1 %v2809_v53  ;;  %v2810_v58 = vld [vmem:[#allocation11 + $0x30] sm:$0xff]   ;;  %v2812_v48 = vld [vmem:[#allocation11 + $0x20] sm:$0xff]  }
 0x224   :  { %v706_v61 = vpop.f32.mrf.mxu1  ;;  %2578 = vmatprep.subr.bf16.mxu1 %v2810_v58 }
 0x225   :  { %v835_v0 = vpack.c.bf16 %v806_v60, %v805_v62  ;;  %v707_v5 = vadd.f32 %v3306_v36, %v706_v61  ;;  %v811_v15 = vmax.f32 %v715_v12, 0.0 }
 0x226   :  { %v2555_v1 = vpop.f32.mrf.mxu1 }
 0x227   :  { %1000 = vmatmul.mubr.bf16.gmra.mxu0 %v834_v55  ;;  %v809_v8 = vmax.f32 %v707_v5, 0.0  ;;  %v718_v13 = vadd.f32 %v2555_v1, %v3306_v36  ;;  %2579 = vmatpush3.bf16.msra.mxu1 %v2810_v58 }
 0x228   :  { %1009 = vmatprep.mubr.bf16.mxu0 %v3123_v46  ;;  %v709_v2 = vpop.f32.mrf.mxu1  ;;  %2580 = vmatprep.subr.bf16.mxu1 %v2811_v63 }
 0x229   :  { %v710_v6 = vadd.f32 %v3306_v36, %v709_v2  ;;  %v812_v11 = vmax.f32 %v718_v13, 0.0 }
 0x22a   :  { %v2558_v7 = vpop.f32.mrf.mxu1 }
 0x22b   :  { %v810_v9 = vmax.f32 %v710_v6, 0.0  ;;  %v838_v17 = vpack.c.bf16 %v812_v11, %v811_v15  ;;  %v731_v25 = vadd.f32 %v2558_v7, %v3306_v36  ;;  %2581 = vmatpush3.bf16.msra.mxu1 %v2811_v63  ;;  %v2813_v6 = vld [vmem:[#allocation11 + $0x18] sm:$0xff]   ;;  %v2815_v15 = vld [vmem:[#allocation11 + $0x8] sm:$0xff]  }
 0x22c   :  { %v722_v10 = vpop.f32.mrf.mxu1  ;;  %2582 = vmatprep.subr.bf16.mxu1 %v2812_v48 }
 0x22d   :  { %v837_v14 = vpack.c.bf16 %v810_v9, %v809_v8  ;;  %v723_v18 = vadd.f32 %v3306_v36, %v722_v10  ;;  %v815_v28 = vmax.f32 %v731_v25, 0.0  ;;  %v2814_v10 = vld [vmem:[#allocation11 + $0x10] sm:$0xff]  }
 0x22e   :  { %v2559_v57 = vpop.f32.mrf.mxu1 }
 0x22f   :  { %1010 = vmatmul.mubr.bf16.gmra.mxu0 %v835_v0  ;;  %v813_v21 = vmax.f32 %v723_v18, 0.0  ;;  %v734_v23 = vadd.f32 %v2559_v57, %v3306_v36  ;;  %2583 = vmatpush3.bf16.msra.mxu1 %v2812_v48  ;;  %v2816_v18 = vld [vmem:[#allocation11] sm:$0xff]  }
 0x230   :  { %1019 = vmatprep.mubr.bf16.mxu0 %v3123_v46  ;;  %v725_v16 = vpop.f32.mrf.mxu1  ;;  %2584 = vmatprep.subr.bf16.mxu1 %v2813_v6 }
 0x231   :  { %v726_v19 = vadd.f32 %v3306_v36, %v725_v16  ;;  %v816_v29 = vmax.f32 %v734_v23, 0.0 }
 0x232   :  { %v2562_v20 = vpop.f32.mrf.mxu1 }
 0x233   :  { %v814_v22 = vmax.f32 %v726_v19, 0.0  ;;  %v840_v31 = vpack.c.bf16 %v816_v29, %v815_v28  ;;  %v747_v39 = vadd.f32 %v2562_v20, %v3306_v36  ;;  %2585 = vmatpush3.bf16.msra.mxu1 %v2813_v6 }
 0x234   :  { %v738_v24 = vpop.f32.mrf.mxu1  ;;  %2586 = vmatprep.subr.bf16.mxu1 %v2814_v10 }
 0x235   :  { %v839_v26 = vpack.c.bf16 %v814_v22, %v813_v21  ;;  %v739_v32 = vadd.f32 %v3306_v36, %v738_v24  ;;  %v819_v44 = vmax.f32 %v747_v39, 0.0 }
 0x236   :  { %v2563_v27 = vpop.f32.mrf.mxu1 }
 0x237   :  { %1020 = vmatmul.mubr.bf16.gmra.mxu0 %v836_v3  ;;  %v817_v35 = vmax.f32 %v739_v32, 0.0  ;;  %v750_v40 = vadd.f32 %v2563_v27, %v3306_v36  ;;  %2587 = vmatpush3.bf16.msra.mxu1 %v2814_v10 }
 0x238   :  { %1029 = vmatprep.mubr.bf16.mxu0 %v3123_v46  ;;  %v741_v30 = vpop.f32.mrf.mxu1  ;;  %2588 = vmatprep.subr.bf16.mxu1 %v2815_v15 }
 0x239   :  { %v742_v33 = vadd.f32 %v3306_v36, %v741_v30  ;;  %v820_v47 = vmax.f32 %v750_v40, 0.0  ;;  %v867_v30 = vlaneseq }
 0x23a   :  { %v2566_v34 = vpop.f32.mrf.mxu1 }
 0x23b   :  { %v818_v37 = vmax.f32 %v742_v33, 0.0  ;;  %v842_v45 = vpack.c.bf16 %v820_v47, %v819_v44  ;;  %v763_v59 = vadd.f32 %v2566_v34, %v3306_v36  ;;  %2589 = vmatpush3.bf16.msra.mxu1 %v2815_v15  ;;  %v865_v33 = vld [vmem:[%s3669_s7] sm:$0x3]  ;;  %v2817_v15 = vld [vmem:[#allocation13 + $0x38] sm:$0xff]  }
 0x23c   :  { %v754_v38 = vpop.f32.mrf.mxu1  ;;  %2590 = vmatprep.subr.bf16.mxu1 %v2816_v18 }
 0x23d   :  { %v841_v41 = vpack.c.bf16 %v818_v37, %v817_v35  ;;  %v755_v50 = vadd.f32 %v3306_v36, %v754_v38  ;;  %v823_v0 = vmax.f32 %v763_v59, 0.0 }
 0x23e   :  { %v2567_v42 = vpop.f32.mrf.mxu1 }
 0x23f   :  { %1030 = vmatmul.mubr.bf16.gmra.mxu0 %v837_v14  ;;  %v821_v54 = vmax.f32 %v755_v50, 0.0  ;;  %v766_v60 = vadd.f32 %v2567_v42, %v3306_v36  ;;  %2591 = vmatpush3.bf16.msra.mxu1 %v2816_v18 }
 0x240   :  { %1039 = vmatprep.mubr.bf16.mxu0 %v3123_v46  ;;  %v757_v49 = vpop.f32.mrf.mxu1  ;;  %2624 = vmatprep.subr.bf16.mxu1 %v2817_v15 }
 0x241   :  { %v758_v51 = vadd.f32 %v3306_v36, %v757_v49  ;;  %v824_v1 = vmax.f32 %v766_v60, 0.0 }
 0x242   :  { %v2570_v52 = vpop.f32.mrf.mxu1 }
 0x243   :  { %v822_v55 = vmax.f32 %v758_v51, 0.0  ;;  %v844_v2 = vpack.c.bf16 %v824_v1, %v823_v0  ;;  %v779_v12 = vadd.f32 %v2570_v52, %v3306_v36 }
 0x244   :  { %v770_v56 = vpop.f32.mrf.mxu1 }
 0x245   :  { %v843_v61 = vpack.c.bf16 %v822_v55, %v821_v54  ;;  %v771_v4 = vadd.f32 %v3306_v36, %v770_v56  ;;  %v827_v11 = vmax.f32 %v779_v12, 0.0  ;;  %v1247_v12 = vld [vmem:[#allocation5 + $0x8] sm:$0xff] }
 0x246   :  { %v2571_v62 = vpop.f32.mrf.mxu1 }
 0x247   :  { %1040 = vmatmul.mubr.bf16.gmra.mxu0 %v838_v17  ;;  %v825_v7 = vmax.f32 %v771_v4, 0.0  ;;  %v782_v13 = vadd.f32 %v2571_v62, %v3306_v36 }
 0x248   :  { %1049 = vmatprep.mubr.bf16.mxu0 %v3123_v46  ;;  %v773_v43 = vpop.f32.mrf.mxu1 }
 0x249   :  { %v774_v3 = vadd.f32 %v3306_v36, %v773_v43  ;;  %v828_v16 = vmax.f32 %v782_v13, 0.0 }
 0x24a   :  { %v2574_v5 = vpop.f32.mrf.mxu1 }
 0x24b   :  { %v826_v8 = vmax.f32 %v774_v3, 0.0  ;;  %v846_v19 = vpack.c.bf16 %v828_v16, %v827_v11  ;;  %v795_v25 = vadd.f32 %v2574_v5, %v3306_v36  ;;  %v1246_v5 = vld [vmem:[#allocation5] sm:$0xff] }
 0x24c   :  { %v786_v9 = vpop.f32.mrf.mxu1 }
 0x24d   :  { %v845_v14 = vpack.c.bf16 %v826_v8, %v825_v7  ;;  %v787_v20 = vadd.f32 %v3306_v36, %v786_v9  ;;  %v831_v27 = vmax.f32 %v795_v25, 0.0 }
 0x24e   :  { %v2575_v57 = vpop.f32.mrf.mxu1 }
 0x24f   :  { %1050 = vmatmul.mubr.bf16.gmra.mxu0 %v839_v26  ;;  %v829_v22 = vmax.f32 %v787_v20, 0.0  ;;  %v798_v23 = vadd.f32 %v2575_v57, %v3306_v36 }
 0x250   :  { %1059 = vmatprep.mubr.bf16.mxu0 %v3123_v46  ;;  %v789_v17 = vpop.f32.mrf.mxu1 }
 0x251   :  { %v790_v21 = vadd.f32 %v3306_v36, %v789_v17  ;;  %v832_v28 = vmax.f32 %v798_v23, 0.0  ;;  %v1248_v23 = vld [vmem:[#allocation5 + $0x10] sm:$0xff] }
 0x253   :  { %v830_v24 = vmax.f32 %v790_v21, 0.0  ;;  %v848_v29 = vpack.c.bf16 %v832_v28, %v831_v27 }
 0x255   :  { %v847_v26 = vpack.c.bf16 %v830_v24, %v829_v22 }
 0x257   :  { %1060 = vmatmul.mubr.bf16.gmra.mxu0 %v840_v31  ;;  %v868_v31 = vshrl.u32 %v867_v30, 7 }
 0x258   :  { %1069 = vmatprep.mubr.bf16.mxu0 %v3123_v46 }
 0x259   :  { %v869_v32 = vsub.s32 0, %v868_v31  ;;  %v873_v34 = vsub.s32 1, %v868_v31 }
 0x25b   :  { %v3358_v35 = vrot.slane %v865_v33, %v869_v32  ;;  %v3360_v37 = vrot.slane %v865_v33, %v873_v34  ;;  %v1249_v32 = vld [vmem:[#allocation5 + $0x18] sm:$0xff] }
 0x25f   :  { %1070 = vmatmul.mubr.bf16.gmra.mxu0 %v841_v41 }
 0x260   :  { %1079 = vmatprep.mubr.bf16.mxu0 %v3123_v46 }
 0x267   :  { %1080 = vmatmul.mubr.bf16.gmra.mxu0 %v842_v45 }
 0x268   :  { %1089 = vmatprep.mubr.bf16.mxu0 %v3123_v46 }
 0x26f   :  { %1090 = vmatmul.mubr.bf16.gmra.mxu0 %v843_v61 }
 0x270   :  { %1099 = vmatprep.mubr.bf16.mxu0 %v3123_v46 }
 0x277   :  { %1100 = vmatmul.mubr.bf16.gmra.mxu0 %v844_v2 }
 0x278   :  { %1109 = vmatprep.mubr.bf16.mxu0 %v3123_v46 }
 0x27f   :  { %1110 = vmatmul.mubr.bf16.gmra.mxu0 %v845_v14 }
 0x280   :  { %1119 = vmatprep.mubr.bf16.mxu0 %v3123_v46 }
 0x287   :  { %1120 = vmatmul.mubr.bf16.gmra.mxu0 %v846_v19 }
 0x288   :  { %1129 = vmatprep.mubr.bf16.mxu0 %v3123_v46 }
 0x28f   :  { %1130 = vmatmul.mubr.bf16.gmra.mxu0 %v847_v26 }
 0x290   :  { %1139 = vmatprep.mubr.bf16.mxu0 %v3123_v46 }
 0x297   :  { %1140 = vmatmul.mubr.bf16.gmra.mxu0 %v848_v29 }
 0x2df   :  { %v991_v36 = vpop.f32.mrf.mxu0 }
 0x2e0   :  { %v3363_v38 = vadd.f32 %v991_v36, %v3358_v35 }
 0x2e1   :  { %v993_v46 = vpop.f32.mrf.mxu0 }
 0x2e2   :  { %2182 = vst [vmem:[#allocation17] sm:$0xff] %v3363_v38  ;;  %v994_v39 = vadd.f32 %v993_v46, %v3360_v37 }
 0x2e3   :  { %v995_v40 = vpop.f32.mrf.mxu0 }
 0x2e4   :  { %v1150_v41 = vmul.f32 0.5, %v994_v39  ;;  %2183 = vst [vmem:[#allocation17 + $0x8] sm:$0xff] %v994_v39  ;;  %v3368_v42 = vadd.f32 %v995_v40, %v3358_v35 }
 0x2e5   :  { %v997_v44 = vpop.f32.mrf.mxu0 }
 0x2e6   :  { %v1182_v47 = vmul.f32 1.442695, %v1150_v41  ;;  %2184 = vst [vmem:[#allocation17 + $0x10] sm:$0xff] %v3368_v42  ;;  %v998_v49 = vadd.f32 %v997_v44, %v3360_v37 }
 0x2e7   :  { %v1001_v45 = vpop.f32.mrf.mxu0 }
 0x2e8   :  { %2833 = vpow2.f32 %v1182_v47  ;;  %v1151_v50 = vmul.f32 0.5, %v998_v49  ;;  %2185 = vst [vmem:[#allocation17 + $0x18] sm:$0xff] %v998_v49  ;;  %v3373_v51 = vadd.f32 %v1001_v45, %v3358_v35 }
 0x2e9   :  { %v1003_v52 = vpop.f32.mrf.mxu0 }
 0x2ea   :  { %v1184_v53 = vmul.f32 1.442695, %v1151_v50  ;;  %2186 = vst [vmem:[#allocation17 + $0x20] sm:$0xff] %v3373_v51  ;;  %v1004_v54 = vadd.f32 %v1003_v52, %v3360_v37  ;;  %v1250_v50 = vld [vmem:[#allocation5 + $0x20] sm:$0xff] }
 0x2eb   :  { %v1005_v55 = vpop.f32.mrf.mxu0 }
 0x2ec   :  { %2835 = vpow2.f32 %v1184_v53  ;;  %v1152_v56 = vmul.f32 0.5, %v1004_v54  ;;  %2187 = vst [vmem:[#allocation17 + $0x28] sm:$0xff] %v1004_v54  ;;  %v3378_v58 = vadd.f32 %v1005_v55, %v3358_v35 }
 0x2ed   :  { %v1007_v59 = vpop.f32.mrf.mxu0 }
 0x2ee   :  { %v1186_v60 = vmul.f32 1.442695, %v1152_v56  ;;  %2188 = vst [vmem:[#allocation17 + $0x30] sm:$0xff] %v3378_v58  ;;  %v1008_v61 = vadd.f32 %v1007_v59, %v3360_v37  ;;  %v2818_v59 = vld [vmem:[#allocation13 + $0x30] sm:$0xff]  }
 0x2ef   :  { %v1011_v62 = vpop.f32.mrf.mxu0 }
 0x2f0   :  { %2837 = vpow2.f32 %v1186_v60  ;;  %v1153_v63 = vmul.f32 0.5, %v1008_v61  ;;  %2189 = vst [vmem:[#allocation17 + $0x38] sm:$0xff] %v1008_v61  ;;  %v3383_v0 = vadd.f32 %v1011_v62, %v3358_v35 }
 0x2f1   :  { %v1013_v1 = vpop.f32.mrf.mxu0 }
 0x2f2   :  { %v1188_v43 = vmul.f32 1.442695, %v1153_v63  ;;  %2190 = vst [vmem:[#allocation17 + $0x40] sm:$0xff] %v3383_v0  ;;  %v1014_v48 = vadd.f32 %v1013_v1, %v3360_v37 }
 0x2f3   :  { %v1015_v2 = vpop.f32.mrf.mxu0 }
 0x2f4   :  { %2839 = vpow2.f32 %v1188_v43  ;;  %v1154_v4 = vmul.f32 0.5, %v1014_v48  ;;  %2191 = vst [vmem:[#allocation17 + $0x48] sm:$0xff] %v1014_v48  ;;  %v3388_v3 = vadd.f32 %v1015_v2, %v3358_v35 }
 0x2f5   :  { %v2834_v6 = vpop.eup %2833  ;;  %v1017_v7 = vpop.f32.mrf.mxu0 }
 0x2f6   :  { %v1190_v8 = vmul.f32 1.442695, %v1154_v4  ;;  %2192 = vst [vmem:[#allocation17 + $0x50] sm:$0xff] %v3388_v3  ;;  %v1018_v9 = vadd.f32 %v1017_v7, %v3360_v37  ;;  %v1278_v13 = vmul.f32 %v2834_v6, %v1246_v5  ;;  %v2819_v4 = vld [vmem:[#allocation13 + $0x28] sm:$0xff]  }
 0x2f7   :  { %v1021_v10 = vpop.f32.mrf.mxu0 }
 0x2f8   :  { %2841 = vpow2.f32 %v1190_v8  ;;  %v1155_v14 = vmul.f32 0.5, %v1018_v9  ;;  %2193 = vst [vmem:[#allocation17 + $0x58] sm:$0xff] %v1018_v9  ;;  %v3393_v57 = vadd.f32 %v1021_v10, %v3358_v35  ;;  %v1310_v21 = vadd.f32 %v1278_v13, %v3363_v38  ;;  %v1252_v10 = vld [vmem:[#allocation5 + $0x30] sm:$0xff] }
 0x2f9   :  { %v2836_v11 = vpop.eup %2835  ;;  %v1023_v16 = vpop.f32.mrf.mxu0 }
 0x2fa   :  { %v1192_v17 = vmul.f32 1.442695, %v1155_v14  ;;  %2194 = vst [vmem:[#allocation17 + $0x60] sm:$0xff] %v3393_v57  ;;  %v1024_v18 = vadd.f32 %v1023_v16, %v3360_v37  ;;  %v1279_v19 = vmul.f32 %v2836_v11, %v1247_v12 }
 0x2fb   :  { %v1025_v20 = vpop.f32.mrf.mxu0 }
 0x2fc   :  { %2843 = vpow2.f32 %v1192_v17  ;;  %v1156_v22 = vmul.f32 0.5, %v1024_v18  ;;  %2195 = vst [vmem:[#allocation17 + $0x68] sm:$0xff] %v1024_v18  ;;  %v3399_v24 = vadd.f32 %v1025_v20, %v3358_v35  ;;  %v1311_v25 = vadd.f32 %v1279_v19, %v3368_v42  ;;  %v1253_v17 = vld [vmem:[#allocation5 + $0x38] sm:$0xff] }
 0x2fd   :  { %v2838_v26 = vpop.eup %2837  ;;  %v1027_v27 = vpop.f32.mrf.mxu0 }
 0x2fe   :  { %v1194_v28 = vmul.f32 1.442695, %v1156_v22  ;;  %2196 = vst [vmem:[#allocation17 + $0x70] sm:$0xff] %v3399_v24  ;;  %v1028_v29 = vadd.f32 %v1027_v27, %v3360_v37  ;;  %v1342_v30 = vpack.c.bf16 %v1311_v25, %v1310_v21  ;;  %v1280_v33 = vmul.f32 %v2838_v26, %v1248_v23  ;;  %v2821_v26 = vld [vmem:[#allocation13 + $0x18] sm:$0xff]  }
 0x2ff   :  { %v1031_v31 = vpop.f32.mrf.mxu0 }
 0x300   :  { %2845 = vpow2.f32 %v1194_v28  ;;  %v1157_v34 = vmul.f32 0.5, %v1028_v29  ;;  %2197 = vst [vmem:[#allocation17 + $0x78] sm:$0xff] %v1028_v29  ;;  %v3405_v36 = vadd.f32 %v1031_v31, %v3358_v35  ;;  %2592 = vmatprep.mubr.bf16.mxu1 %v1342_v30  ;;  %v1312_v44 = vadd.f32 %v1280_v33, %v3373_v51  ;;  %v1251_v51 = vld [vmem:[#allocation5 + $0x28] sm:$0xff] }
 0x301   :  { %v2840_v38 = vpop.eup %2839  ;;  %v1033_v46 = vpop.f32.mrf.mxu0 }
 0x302   :  { %v1196_v39 = vmul.f32 1.442695, %v1157_v34  ;;  %2198 = vst [vmem:[#allocation17 + $0x80] sm:$0xff] %v3405_v36  ;;  %v1034_v40 = vadd.f32 %v1033_v46, %v3360_v37  ;;  %v1281_v41 = vmul.f32 %v2840_v38, %v1249_v32  ;;  %v1254_v32 = vld [vmem:[#allocation5 + $0x40] sm:$0xff] }
 0x303   :  { %v1035_v42 = vpop.f32.mrf.mxu0 }
 0x304   :  { %2847 = vpow2.f32 %v1196_v39  ;;  %v1158_v47 = vmul.f32 0.5, %v1034_v40  ;;  %2199 = vst [vmem:[#allocation17 + $0x88] sm:$0xff] %v1034_v40  ;;  %v3411_v49 = vadd.f32 %v1035_v42, %v3358_v35  ;;  %v1313_v45 = vadd.f32 %v1281_v41, %v3378_v58  ;;  %v1255_v40 = vld [vmem:[#allocation5 + $0x48] sm:$0xff] }
 0x305   :  { %v2842_v52 = vpop.eup %2841  ;;  %v1037_v53 = vpop.f32.mrf.mxu0 }
 0x306   :  { %v1198_v54 = vmul.f32 1.442695, %v1158_v47  ;;  %2200 = vst [vmem:[#allocation17 + $0x90] sm:$0xff] %v3411_v49  ;;  %v1038_v55 = vadd.f32 %v1037_v53, %v3360_v37  ;;  %v1343_v56 = vpack.c.bf16 %v1313_v45, %v1312_v44  ;;  %v1282_v61 = vmul.f32 %v2842_v52, %v1250_v50 }
 0x307   :  { %v1041_v60 = vpop.f32.mrf.mxu0 }
 0x308   :  { %2849 = vpow2.f32 %v1198_v54  ;;  %v1159_v62 = vmul.f32 0.5, %v1038_v55  ;;  %2201 = vst [vmem:[#allocation17 + $0x98] sm:$0xff] %v1038_v55  ;;  %v3417_v63 = vadd.f32 %v1041_v60, %v3358_v35  ;;  %2593 = vmatmul.mubr.bf16.vlgmr.msra.gmra.mxu1 %v1343_v56  ;;  %v1314_v6 = vadd.f32 %v1282_v61, %v3383_v0  ;;  %v2820_v0 = vld [vmem:[#allocation13 + $0x20] sm:$0xff]   ;;  %v1256_v60 = vld [vmem:[#allocation5 + $0x50] sm:$0xff] }
 0x309   :  { %v2844_v58 = vpop.eup %2843  ;;  %v1043_v1 = vpop.f32.mrf.mxu0  ;;  %2625 = vmatpush3.bf16.msra.mxu1 %v2817_v15 }
 0x30a   :  { %v1200_v43 = vmul.f32 1.442695, %v1159_v62  ;;  %2202 = vst [vmem:[#allocation17 + $0xa0] sm:$0xff] %v3417_v63  ;;  %v1044_v48 = vadd.f32 %v1043_v1, %v3360_v37  ;;  %v1283_v2 = vmul.f32 %v2844_v58, %v1251_v51  ;;  %2626 = vmatprep.subr.bf16.mxu1 %v2818_v59 }
 0x30b   :  { %v1045_v5 = vpop.f32.mrf.mxu0 }
 0x30c   :  { %2851 = vpow2.f32 %v1200_v43  ;;  %v1160_v7 = vmul.f32 0.5, %v1044_v48  ;;  %2203 = vst [vmem:[#allocation17 + $0xa8] sm:$0xff] %v1044_v48  ;;  %v3423_v8 = vadd.f32 %v1045_v5, %v3358_v35  ;;  %v1315_v9 = vadd.f32 %v1283_v2, %v3388_v3  ;;  %v1257_v48 = vld [vmem:[#allocation5 + $0x58] sm:$0xff] }
 0x30d   :  { %v2846_v12 = vpop.eup %2845  ;;  %v1047_v13 = vpop.f32.mrf.mxu0  ;;  %2627 = vmatpush3.bf16.msra.mxu1 %v2818_v59 }
 0x30e   :  { %v1202_v14 = vmul.f32 1.442695, %v1160_v7  ;;  %2204 = vst [vmem:[#allocation17 + $0xb0] sm:$0xff] %v3423_v8  ;;  %v1048_v15 = vadd.f32 %v1047_v13, %v3360_v37  ;;  %v1344_v11 = vpack.c.bf16 %v1315_v9, %v1314_v6  ;;  %2628 = vmatprep.subr.bf16.mxu1 %v2819_v4  ;;  %v1284_v18 = vmul.f32 %v2846_v12, %v1252_v10 }
 0x30f   :  { %v1051_v16 = vpop.f32.mrf.mxu0 }
 0x310   :  { %2853 = vpow2.f32 %v1202_v14  ;;  %v1161_v19 = vmul.f32 0.5, %v1048_v15  ;;  %2205 = vst [vmem:[#allocation17 + $0xb8] sm:$0xff] %v1048_v15  ;;  %v3429_v3 = vadd.f32 %v1051_v16, %v3358_v35  ;;  %2596 = vmatprep.mubr.bf16.mxu1 %v1344_v11  ;;  %v1316_v28 = vadd.f32 %v1284_v18, %v3393_v57  ;;  %v1258_v11 = vld [vmem:[#allocation5 + $0x60] sm:$0xff] }
 0x311   :  { %v2848_v20 = vpop.eup %2847  ;;  %v1053_v21 = vpop.f32.mrf.mxu0  ;;  %2629 = vmatpush3.bf16.msra.mxu1 %v2819_v4 }
 0x312   :  { %v1204_v22 = vmul.f32 1.442695, %v1161_v19  ;;  %2206 = vst [vmem:[#allocation17 + $0xc0] sm:$0xff] %v3429_v3  ;;  %v1054_v25 = vadd.f32 %v1053_v21, %v3360_v37  ;;  %v1285_v23 = vmul.f32 %v2848_v20, %v1253_v17  ;;  %2630 = vmatprep.subr.bf16.mxu1 %v2820_v0  ;;  %v1259_v21 = vld [vmem:[#allocation5 + $0x68] sm:$0xff] }
 0x313   :  { %v1055_v27 = vpop.f32.mrf.mxu0 }
 0x314   :  { %2855 = vpow2.f32 %v1204_v22  ;;  %v1162_v29 = vmul.f32 0.5, %v1054_v25  ;;  %2207 = vst [vmem:[#allocation17 + $0xc8] sm:$0xff] %v1054_v25  ;;  %v3435_v30 = vadd.f32 %v1055_v27, %v3358_v35  ;;  %v1317_v31 = vadd.f32 %v1285_v23, %v3399_v24 }
 0x315   :  { %v2850_v33 = vpop.eup %2849  ;;  %v1057_v34 = vpop.f32.mrf.mxu0  ;;  %2631 = vmatpush3.bf16.msra.mxu1 %v2820_v0 }
 0x316   :  { %v1206_v38 = vmul.f32 1.442695, %v1162_v29  ;;  %2208 = vst [vmem:[#allocation17 + $0xd0] sm:$0xff] %v3435_v30  ;;  %v1058_v46 = vadd.f32 %v1057_v34, %v3360_v37  ;;  %v1345_v39 = vpack.c.bf16 %v1317_v31, %v1316_v28  ;;  %2632 = vmatprep.subr.bf16.mxu1 %v2821_v26  ;;  %v1286_v41 = vmul.f32 %v2850_v33, %v1254_v32 }
 0x317   :  { %v1061_v57 = vpop.f32.mrf.mxu0 }
 0x318   :  { %2857 = vpow2.f32 %v1206_v38  ;;  %v1163_v42 = vmul.f32 0.5, %v1058_v46  ;;  %2209 = vst [vmem:[#allocation17 + $0xd8] sm:$0xff] %v1058_v46  ;;  %v3441_v44 = vadd.f32 %v1061_v57, %v3358_v35  ;;  %2597 = vmatmul.mubr.bf16.gmra.mxu1 %v1345_v39  ;;  %v1318_v54 = vadd.f32 %v1286_v41, %v3405_v36  ;;  %v1260_v38 = vld [vmem:[#allocation5 + $0x70] sm:$0xff] }
 0x319   :  { %v2852_v24 = vpop.eup %2851  ;;  %v1063_v47 = vpop.f32.mrf.mxu0  ;;  %2633 = vmatpush3.bf16.msra.mxu1 %v2821_v26 }
 0x31a   :  { %v1208_v45 = vmul.f32 1.442695, %v1163_v42  ;;  %2210 = vst [vmem:[#allocation17 + $0xe0] sm:$0xff] %v3441_v44  ;;  %v1064_v50 = vadd.f32 %v1063_v47, %v3360_v37  ;;  %v1287_v52 = vmul.f32 %v2852_v24, %v1255_v40  ;;  %v1261_v24 = vld [vmem:[#allocation5 + $0x78] sm:$0xff] }
 0x31b   :  { %v1065_v53 = vpop.f32.mrf.mxu0 }
 0x31c   :  { %2859 = vpow2.f32 %v1208_v45  ;;  %v1164_v55 = vmul.f32 0.5, %v1064_v50  ;;  %2211 = vst [vmem:[#allocation17 + $0xe8] sm:$0xff] %v1064_v50  ;;  %v3447_v56 = vadd.f32 %v1065_v53, %v3358_v35  ;;  %v1319_v59 = vadd.f32 %v1287_v52, %v3411_v49 }
 0x31d   :  { %v2854_v51 = vpop.eup %2853  ;;  %v1067_v61 = vpop.f32.mrf.mxu0 }
 0x31e   :  { %v1210_v62 = vmul.f32 1.442695, %v1164_v55  ;;  %2212 = vst [vmem:[#allocation17 + $0xf0] sm:$0xff] %v3447_v56  ;;  %v1068_v58 = vadd.f32 %v1067_v61, %v3360_v37  ;;  %v1346_v1 = vpack.c.bf16 %v1319_v59, %v1318_v54  ;;  %v1288_v36 = vmul.f32 %v2854_v51, %v1256_v60 }
 0x31f   :  { %v1071_v43 = vpop.f32.mrf.mxu0 }
 0x320   :  { %2861 = vpow2.f32 %v1210_v62  ;;  %v1165_v2 = vmul.f32 0.5, %v1068_v58  ;;  %2213 = vst [vmem:[#allocation17 + $0xf8] sm:$0xff] %v1068_v58  ;;  %v3453_v4 = vadd.f32 %v1071_v43, %v3358_v35  ;;  %2600 = vmatprep.mubr.bf16.mxu1 %v1346_v1  ;;  %v1320_v12 = vadd.f32 %v1288_v36, %v3417_v63  ;;  %v1262_v62 = vld [vmem:[#allocation5 + $0x80] sm:$0xff] }
 0x321   :  { %v2856_v49 = vpop.eup %2855  ;;  %v1073_v5 = vpop.f32.mrf.mxu0 }
 0x322   :  { %v1212_v6 = vmul.f32 1.442695, %v1165_v2  ;;  %2214 = vst [vmem:[#allocation17 + $0x100] sm:$0xff] %v3453_v4  ;;  %v1074_v7 = vadd.f32 %v1073_v5, %v3360_v37  ;;  %v1289_v9 = vmul.f32 %v2856_v49, %v1257_v48  ;;  %v1263_v49 = vld [vmem:[#allocation5 + $0x88] sm:$0xff] }
 0x323   :  { %v1075_v10 = vpop.f32.mrf.mxu0 }
 0x324   :  { %2863 = vpow2.f32 %v1212_v6  ;;  %v1166_v13 = vmul.f32 0.5, %v1074_v7  ;;  %2215 = vst [vmem:[#allocation17 + $0x108] sm:$0xff] %v1074_v7  ;;  %v3459_v14 = vadd.f32 %v1075_v10, %v3358_v35  ;;  %v1321_v15 = vadd.f32 %v1289_v9, %v3423_v8 }
 0x325   :  { %v2858_v0 = vpop.eup %2857  ;;  %v1077_v16 = vpop.f32.mrf.mxu0 }
 0x326   :  { %v1214_v17 = vmul.f32 1.442695, %v1166_v13  ;;  %2216 = vst [vmem:[#allocation17 + $0x110] sm:$0xff] %v3459_v14  ;;  %v1078_v18 = vadd.f32 %v1077_v16, %v3360_v37  ;;  %v1347_v19 = vpack.c.bf16 %v1321_v15, %v1320_v12  ;;  %v1290_v63 = vmul.f32 %v2858_v0, %v1258_v11 }
 0x327   :  { %v1081_v20 = vpop.f32.mrf.mxu0 }
 0x328   :  { %2865 = vpow2.f32 %v1214_v17  ;;  %v1167_v22 = vmul.f32 0.5, %v1078_v18  ;;  %2217 = vst [vmem:[#allocation17 + $0x118] sm:$0xff] %v1078_v18  ;;  %v3465_v25 = vadd.f32 %v1081_v20, %v3358_v35  ;;  %2601 = vmatmul.mubr.bf16.gmra.mxu1 %v1347_v19  ;;  %v1322_v31 = vadd.f32 %v1290_v63, %v3429_v3  ;;  %v1264_v17 = vld [vmem:[#allocation5 + $0x90] sm:$0xff] }
 0x329   :  { %v2860_v8 = vpop.eup %2859  ;;  %v1083_v23 = vpop.f32.mrf.mxu0 }
 0x32a   :  { %v1216_v26 = vmul.f32 1.442695, %v1167_v22  ;;  %2218 = vst [vmem:[#allocation17 + $0x120] sm:$0xff] %v3465_v25  ;;  %v1084_v27 = vadd.f32 %v1083_v23, %v3360_v37  ;;  %v1291_v28 = vmul.f32 %v2860_v8, %v1259_v21  ;;  %v1265_v8 = vld [vmem:[#allocation5 + $0x98] sm:$0xff] }
 0x32b   :  { %v1085_v29 = vpop.f32.mrf.mxu0 }
 0x32c   :  { %2867 = vpow2.f32 %v1216_v26  ;;  %v1168_v32 = vmul.f32 0.5, %v1084_v27  ;;  %2219 = vst [vmem:[#allocation17 + $0x128] sm:$0xff] %v1084_v27  ;;  %v3471_v33 = vadd.f32 %v1085_v29, %v3358_v35  ;;  %v1323_v34 = vadd.f32 %v1291_v28, %v3435_v30 }
 0x32d   :  { %v2862_v46 = vpop.eup %2861  ;;  %v1087_v39 = vpop.f32.mrf.mxu0 }
 0x32e   :  { %v1218_v57 = vmul.f32 1.442695, %v1168_v32  ;;  %2220 = vst [vmem:[#allocation17 + $0x130] sm:$0xff] %v3471_v33  ;;  %v1088_v40 = vadd.f32 %v1087_v39, %v3360_v37  ;;  %v1348_v41 = vpack.c.bf16 %v1323_v34, %v1322_v31  ;;  %v1292_v3 = vmul.f32 %v2862_v46, %v1260_v38 }
 0x32f   :  { %v1091_v42 = vpop.f32.mrf.mxu0 }
 0x330   :  { %2869 = vpow2.f32 %v1218_v57  ;;  %v1169_v47 = vmul.f32 0.5, %v1088_v40  ;;  %2221 = vst [vmem:[#allocation17 + $0x138] sm:$0xff] %v1088_v40  ;;  %v3477_v45 = vadd.f32 %v1091_v42, %v3358_v35  ;;  %2604 = vmatprep.mubr.bf16.mxu1 %v1348_v41  ;;  %v1324_v59 = vadd.f32 %v1292_v3, %v3441_v44  ;;  %v1266_v57 = vld [vmem:[#allocation5 + $0xa0] sm:$0xff] }
 0x331   :  { %v2864_v30 = vpop.eup %2863  ;;  %v1093_v50 = vpop.f32.mrf.mxu0 }
 0x332   :  { %v1220_v52 = vmul.f32 1.442695, %v1169_v47  ;;  %2222 = vst [vmem:[#allocation17 + $0x140] sm:$0xff] %v3477_v45  ;;  %v1094_v53 = vadd.f32 %v1093_v50, %v3360_v37  ;;  %v1293_v54 = vmul.f32 %v2864_v30, %v1261_v24  ;;  %v1267_v30 = vld [vmem:[#allocation5 + $0xa8] sm:$0xff] }
 0x333   :  { %v1095_v55 = vpop.f32.mrf.mxu0 }
 0x334   :  { %2871 = vpow2.f32 %v1220_v52  ;;  %v1170_v60 = vmul.f32 0.5, %v1094_v53  ;;  %2223 = vst [vmem:[#allocation17 + $0x148] sm:$0xff] %v1094_v53  ;;  %v3483_v51 = vadd.f32 %v1095_v55, %v3358_v35  ;;  %v1325_v61 = vadd.f32 %v1293_v54, %v3447_v56 }
 0x335   :  { %v2866_v58 = vpop.eup %2865  ;;  %v1097_v1 = vpop.f32.mrf.mxu0 }
 0x336   :  { %v1222_v43 = vmul.f32 1.442695, %v1170_v60  ;;  %2224 = vst [vmem:[#allocation17 + $0x150] sm:$0xff] %v3483_v51  ;;  %v1098_v48 = vadd.f32 %v1097_v1, %v3360_v37  ;;  %v1349_v36 = vpack.c.bf16 %v1325_v61, %v1324_v59  ;;  %v1294_v44 = vmul.f32 %v2866_v58, %v1262_v62 }
 0x337   :  { %v1101_v2 = vpop.f32.mrf.mxu0 }
 0x338   :  { %2873 = vpow2.f32 %v1222_v43  ;;  %v1171_v5 = vmul.f32 0.5, %v1098_v48  ;;  %2225 = vst [vmem:[#allocation17 + $0x158] sm:$0xff] %v1098_v48  ;;  %v3489_v6 = vadd.f32 %v1101_v2, %v3358_v35  ;;  %2605 = vmatmul.mubr.bf16.gmra.mxu1 %v1349_v36  ;;  %v1326_v15 = vadd.f32 %v1294_v44, %v3453_v4  ;;  %v1268_v48 = vld [vmem:[#allocation5 + $0xb0] sm:$0xff]  ;;  %v2823_v36 = vld [vmem:[#allocation13 + $0x8] sm:$0xff]  }
 0x339   :  { %v2868_v56 = vpop.eup %2867  ;;  %v1103_v7 = vpop.f32.mrf.mxu0 }
 0x33a   :  { %v1224_v9 = vmul.f32 1.442695, %v1171_v5  ;;  %2226 = vst [vmem:[#allocation17 + $0x160] sm:$0xff] %v3489_v6  ;;  %v1104_v10 = vadd.f32 %v1103_v7, %v3360_v37  ;;  %v1295_v12 = vmul.f32 %v2868_v56, %v1263_v49  ;;  %v1269_v7 = vld [vmem:[#allocation5 + $0xb8] sm:$0xff] }
 0x33b   :  { %v1105_v13 = vpop.f32.mrf.mxu0 }
 0x33c   :  { %2875 = vpow2.f32 %v1224_v9  ;;  %v1172_v11 = vmul.f32 0.5, %v1104_v10  ;;  %2227 = vst [vmem:[#allocation17 + $0x168] sm:$0xff] %v1104_v10  ;;  %v3495_v0 = vadd.f32 %v1105_v13, %v3358_v35  ;;  %v1327_v16 = vadd.f32 %v1295_v12, %v3459_v14  ;;  %v2824_v12 = vld [vmem:[#allocation13] sm:$0xff]  }
 0x33d   :  { %v2870_v18 = vpop.eup %2869  ;;  %v1107_v19 = vpop.f32.mrf.mxu0 }
 0x33e   :  { %v1226_v20 = vmul.f32 1.442695, %v1172_v11  ;;  %2228 = vst [vmem:[#allocation17 + $0x170] sm:$0xff] %v3495_v0  ;;  %v1108_v21 = vadd.f32 %v1107_v19, %v3360_v37  ;;  %v1350_v63 = vpack.c.bf16 %v1327_v16, %v1326_v15  ;;  %v1296_v4 = vmul.f32 %v2870_v18, %v1264_v17 }
 0x33f   :  { %v1111_v22 = vpop.f32.mrf.mxu0 }
 0x340   :  { %2877 = vpow2.f32 %v1226_v20  ;;  %v1173_v23 = vmul.f32 0.5, %v1108_v21  ;;  %2229 = vst [vmem:[#allocation17 + $0x178] sm:$0xff] %v1108_v21  ;;  %v3501_v26 = vadd.f32 %v1111_v22, %v3358_v35  ;;  %2608 = vmatprep.mubr.bf16.mxu1 %v1350_v63  ;;  %v1328_v34 = vadd.f32 %v1296_v4, %v3465_v25  ;;  %v1270_v22 = vld [vmem:[#allocation5 + $0xc0] sm:$0xff] }
 0x341   :  { %v2872_v14 = vpop.eup %2871  ;;  %v1113_v27 = vpop.f32.mrf.mxu0 }
 0x342   :  { %v1228_v28 = vmul.f32 1.442695, %v1173_v23  ;;  %2230 = vst [vmem:[#allocation17 + $0x180] sm:$0xff] %v3501_v26  ;;  %v1114_v29 = vadd.f32 %v1113_v27, %v3360_v37  ;;  %v1297_v31 = vmul.f32 %v2872_v14, %v1265_v8 }
 0x343   :  { %v1115_v32 = vpop.f32.mrf.mxu0 }
 0x344   :  { %2879 = vpow2.f32 %v1228_v28  ;;  %v1174_v38 = vmul.f32 0.5, %v1114_v29  ;;  %2231 = vst [vmem:[#allocation17 + $0x188] sm:$0xff] %v1114_v29  ;;  %v3507_v46 = vadd.f32 %v1115_v32, %v3358_v35  ;;  %v1329_v39 = vadd.f32 %v1297_v31, %v3471_v33  ;;  %v2822_v33 = vld [vmem:[#allocation13 + $0x10] sm:$0xff]   ;;  %v1271_v29 = vld [vmem:[#allocation5 + $0xc8] sm:$0xff] }
 0x345   :  { %v2874_v40 = vpop.eup %2873  ;;  %v1117_v41 = vpop.f32.mrf.mxu0  ;;  %2634 = vmatprep.subr.bf16.mxu1 %v2822_v33 }
 0x346   :  { %v1230_v42 = vmul.f32 1.442695, %v1174_v38  ;;  %2232 = vst [vmem:[#allocation17 + $0x190] sm:$0xff] %v3507_v46  ;;  %v1118_v24 = vadd.f32 %v1117_v41, %v3360_v37  ;;  %v1351_v3 = vpack.c.bf16 %v1329_v39, %v1328_v34  ;;  %v1298_v25 = vmul.f32 %v2874_v40, %v1266_v57  ;;  %2635 = vmatpush3.bf16.msra.mxu1 %v2822_v33 }
 0x347   :  { %v1121_v47 = vpop.f32.mrf.mxu0  ;;  %2636 = vmatprep.subr.bf16.mxu1 %v2823_v36 }
 0x348   :  { %2881 = vpow2.f32 %v1230_v42  ;;  %v1175_v50 = vmul.f32 0.5, %v1118_v24  ;;  %2233 = vst [vmem:[#allocation17 + $0x198] sm:$0xff] %v1118_v24  ;;  %v3513_v52 = vadd.f32 %v1121_v47, %v3358_v35  ;;  %2609 = vmatmul.mubr.bf16.gmra.mxu1 %v1351_v3  ;;  %v1330_v62 = vadd.f32 %v1298_v25, %v3477_v45  ;;  %v1272_v25 = vld [vmem:[#allocation5 + $0xd0] sm:$0xff] }
 0x349   :  { %v2876_v53 = vpop.eup %2875  ;;  %v1123_v54 = vpop.f32.mrf.mxu0 }
 0x34a   :  { %v1232_v55 = vmul.f32 1.442695, %v1175_v50  ;;  %2234 = vst [vmem:[#allocation17 + $0x1a0] sm:$0xff] %v3513_v52  ;;  %v1124_v59 = vadd.f32 %v1123_v54, %v3360_v37  ;;  %v1299_v60 = vmul.f32 %v2876_v53, %v1267_v30  ;;  %2637 = vmatpush3.bf16.msra.mxu1 %v2823_v36  ;;  %v1273_v54 = vld [vmem:[#allocation5 + $0xd8] sm:$0xff] }
 0x34b   :  { %v1125_v61 = vpop.f32.mrf.mxu0  ;;  %2638 = vmatprep.subr.bf16.mxu1 %v2824_v12 }
 0x34c   :  { %2883 = vpow2.f32 %v1232_v55  ;;  %v1176_v58 = vmul.f32 0.5, %v1124_v59  ;;  %2235 = vst [vmem:[#allocation17 + $0x1a8] sm:$0xff] %v1124_v59  ;;  %v3519_v1 = vadd.f32 %v1125_v61, %v3358_v35  ;;  %v1331_v43 = vadd.f32 %v1299_v60, %v3483_v51 }
 0x34d   :  { %v2878_v2 = vpop.eup %2877  ;;  %v1127_v49 = vpop.f32.mrf.mxu0 }
 0x34e   :  { %v1234_v44 = vmul.f32 1.442695, %v1176_v58  ;;  %2236 = vst [vmem:[#allocation17 + $0x1b0] sm:$0xff] %v3519_v1  ;;  %v1128_v5 = vadd.f32 %v1127_v49, %v3360_v37  ;;  %v1352_v56 = vpack.c.bf16 %v1331_v43, %v1330_v62  ;;  %v1300_v9 = vmul.f32 %v2878_v2, %v1268_v48  ;;  %2639 = vmatpush3.bf16.msra.mxu1 %v2824_v12  ;;  %v1274_v58 = vld [vmem:[#allocation5 + $0xe0] sm:$0xff]  ;;  %v1275_v48 = vld [vmem:[#allocation5 + $0xe8] sm:$0xff] }
 0x34f   :  { %v1131_v45 = vpop.f32.mrf.mxu0 }
 0x350   :  { %2885 = vpow2.f32 %v1234_v44  ;;  %v1177_v10 = vmul.f32 0.5, %v1128_v5  ;;  %2237 = vst [vmem:[#allocation17 + $0x1b8] sm:$0xff] %v1128_v5  ;;  %v3525_v51 = vadd.f32 %v1131_v45, %v3358_v35  ;;  %2612 = vmatprep.mubr.bf16.mxu1 %v1352_v56  ;;  %v1332_v19 = vadd.f32 %v1300_v9, %v3489_v6  ;;  %v1276_v56 = vld [vmem:[#allocation5 + $0xf0] sm:$0xff] }
 0x351   :  { %v2880_v13 = vpop.eup %2879  ;;  %v1133_v15 = vpop.f32.mrf.mxu0 }
 0x352   :  { %v1236_v11 = vmul.f32 1.442695, %v1177_v10  ;;  %2238 = vst [vmem:[#allocation17 + $0x1c0] sm:$0xff] %v3525_v51  ;;  %v1134_v16 = vadd.f32 %v1133_v15, %v3360_v37  ;;  %v1301_v17 = vmul.f32 %v2880_v13, %v1269_v7  ;;  %v1277_v7 = vld [vmem:[#allocation5 + $0xf8] sm:$0xff] }
 0x353   :  { %v1135_v18 = vpop.f32.mrf.mxu0  ;;  %v2825_v15 = vld [vmem:[#allocation14 + $0x38] sm:$0xff]  }
 0x354   :  { %2887 = vpow2.f32 %v1236_v11  ;;  %v1178_v20 = vmul.f32 0.5, %v1134_v16  ;;  %2239 = vst [vmem:[#allocation17 + $0x1c8] sm:$0xff] %v1134_v16  ;;  %v1136_v21 = vadd.f32 %v1135_v18, %v3358_v35  ;;  %v1333_v63 = vadd.f32 %v1301_v17, %v3495_v0  ;;  %v2826_v11 = vld [vmem:[#allocation14 + $0x30] sm:$0xff]   ;;  %2672 = vmatprep.subr.bf16.mxu0 %v2825_v15  ;;  %v3545_v18 = vld [vmem:[%s3671_s9] ss:$0 sm:$0xff] }
 0x355   :  { %v2882_v8 = vpop.eup %2881  ;;  %v1137_v4 = vpop.f32.mrf.mxu0  ;;  %2673 = vmatpush3.bf16.msra.mxu0 %v2825_v15 }
 0x356   :  { %v1238_v23 = vmul.f32 1.442695, %v1178_v20  ;;  %2240 = vst [vmem:[#allocation17 + $0x1d0] sm:$0xff] %v1136_v21  ;;  %v1138_v14 = vadd.f32 %v1137_v4, %v3360_v37  ;;  %v1353_v27 = vpack.c.bf16 %v1333_v63, %v1332_v19  ;;  %v1302_v31 = vmul.f32 %v2882_v8, %v1270_v22  ;;  %2674 = vmatprep.subr.bf16.mxu0 %v2826_v11  ;;  %v2828_v8 = vld [vmem:[#allocation14 + $0x20] sm:$0xff]  }
 0x357   :  { %v1141_v28 = vpop.f32.mrf.mxu0 }
 0x358   :  { %2889 = vpow2.f32 %v1238_v23  ;;  %v1179_v6 = vmul.f32 0.5, %v1138_v14  ;;  %2241 = vst [vmem:[#allocation17 + $0x1d8] sm:$0xff] %v1138_v14  ;;  %v1142_v32 = vadd.f32 %v1141_v28, %v3358_v35  ;;  %2613 = vmatmul.mubr.bf16.gmra.mxu1 %v1353_v27  ;;  %v1334_v41 = vadd.f32 %v1302_v31, %v3501_v26 }
 0x359   :  { %v2884_v34 = vpop.eup %2883  ;;  %v1143_v38 = vpop.f32.mrf.mxu0  ;;  %2675 = vmatpush3.bf16.msra.mxu0 %v2826_v11 }
 0x35a   :  { %v1240_v0 = vmul.f32 1.442695, %v1179_v6  ;;  %2242 = vst [vmem:[#allocation17 + $0x1e0] sm:$0xff] %v1142_v32  ;;  %v1144_v39 = vadd.f32 %v1143_v38, %v3360_v37  ;;  %v1303_v57 = vmul.f32 %v2884_v34, %v1271_v29  ;;  %v2829_v29 = vld [vmem:[#allocation14 + $0x18] sm:$0xff]  }
 0x35b   :  { %v1145_v40 = vpop.f32.mrf.mxu0 }
 0x35c   :  { %2891 = vpow2.f32 %v1240_v0  ;;  %v1180_v42 = vmul.f32 0.5, %v1144_v39  ;;  %2243 = vst [vmem:[#allocation17 + $0x1e8] sm:$0xff] %v1144_v39  ;;  %v1146_v24 = vadd.f32 %v1145_v40, %v3358_v35  ;;  %v1335_v3 = vadd.f32 %v1303_v57, %v3507_v46 }
 0x35d   :  { %v2886_v47 = vpop.eup %2885  ;;  %v1147_v30 = vpop.f32.mrf.mxu0 }
 0x35e   :  { %v1242_v50 = vmul.f32 1.442695, %v1180_v42  ;;  %2244 = vst [vmem:[#allocation17 + $0x1f0] sm:$0xff] %v1146_v24  ;;  %v1148_v33 = vadd.f32 %v1147_v30, %v3360_v37  ;;  %v1354_v53 = vpack.c.bf16 %v1335_v3, %v1334_v41  ;;  %v1304_v26 = vmul.f32 %v2886_v47, %v1272_v25 }
 0x360   :  { %2893 = vpow2.f32 %v1242_v50  ;;  %v1181_v55 = vmul.f32 0.5, %v1148_v33  ;;  %2245 = vst [vmem:[#allocation17 + $0x1f8] sm:$0xff] %v1148_v33  ;;  %2616 = vmatprep.mubr.bf16.mxu1 %v1354_v53  ;;  %v1336_v35 = vadd.f32 %v1304_v26, %v3513_v52 }
 0x361   :  { %v2888_v59 = vpop.eup %2887 }
 0x362   :  { %v1244_v60 = vmul.f32 1.442695, %v1181_v55  ;;  %v1305_v61 = vmul.f32 %v2888_v59, %v1273_v54 }
 0x364   :  { %2895 = vpow2.f32 %v1244_v60  ;;  %v1337_v46 = vadd.f32 %v1305_v61, %v3519_v1 }
 0x365   :  { %v2890_v62 = vpop.eup %2889 }
 0x366   :  { %v1355_v43 = vpack.c.bf16 %v1337_v46, %v1336_v35  ;;  %v1306_v37 = vmul.f32 %v2890_v62, %v1274_v58 }
 0x368   :  { %2617 = vmatmul.mubr.bf16.gmra.mxu1 %v1355_v43  ;;  %v1338_v49 = vadd.f32 %v1306_v37, %v3525_v51  ;;  %v2827_v51 = vld [vmem:[#allocation14 + $0x28] sm:$0xff]  }
 0x369   :  { %v2892_v36 = vpop.eup %2891  ;;  %2676 = vmatprep.subr.bf16.mxu0 %v2827_v51 }
 0x36a   :  { %v1307_v2 = vmul.f32 %v2892_v36, %v1275_v48  ;;  %2677 = vmatpush3.bf16.msra.mxu0 %v2827_v51 }
 0x36b   :  { %2678 = vmatprep.subr.bf16.mxu0 %v2828_v8 }
 0x36c   :  { %v1339_v44 = vadd.f32 %v1307_v2, %v1136_v21 }
 0x36d   :  { %v2894_v5 = vpop.eup %2893 }
 0x36e   :  { %v1356_v45 = vpack.c.bf16 %v1339_v44, %v1338_v49  ;;  %v1308_v9 = vmul.f32 %v2894_v5, %v1276_v56  ;;  %2679 = vmatpush3.bf16.msra.mxu0 %v2828_v8 }
 0x36f   :  { %2680 = vmatprep.subr.bf16.mxu0 %v2829_v29 }
 0x370   :  { %2620 = vmatprep.mubr.bf16.mxu1 %v1356_v45  ;;  %v1340_v1 = vadd.f32 %v1308_v9, %v1142_v32 }
 0x371   :  { %v2896_v52 = vpop.eup %2895 }
 0x372   :  { %v1309_v10 = vmul.f32 %v2896_v52, %v1277_v7  ;;  %2681 = vmatpush3.bf16.msra.mxu0 %v2829_v29 }
 0x374   :  { %v1341_v12 = vadd.f32 %v1309_v10, %v1146_v24 }
 0x376   :  { %v1357_v13 = vpack.c.bf16 %v1341_v12, %v1340_v1 }
 0x378   :  { %2621 = vmatmul.mubr.bf16.gmra.mxu1 %v1357_v13 }
 0x3c8   :  { %v2594_v16 = vpop.f32.mrf.mxu1 }
 0x3c9   :  { %v1472_v63 = vadd.f32 %v2594_v16, %v3545_v18 }
 0x3ca   :  { %v1463_v17 = vpop.f32.mrf.mxu1 }
 0x3cb   :  { %v1464_v20 = vadd.f32 %v3545_v18, %v1463_v17  ;;  %v1592_v28 = vmax.f32 %v1472_v63, 0.0 }
 0x3cc   :  { %v2595_v19 = vpop.f32.mrf.mxu1 }
 0x3cd   :  { %v1475_v21 = vadd.f32 %v2595_v19, %v3545_v18  ;;  %v1590_v14 = vmax.f32 %v1464_v20, 0.0 }
 0x3ce   :  { %v1466_v22 = vpop.f32.mrf.mxu1 }
 0x3cf   :  { %v1467_v4 = vadd.f32 %v3545_v18, %v1466_v22  ;;  %v1593_v23 = vmax.f32 %v1475_v21, 0.0 }
 0x3d1   :  { %v1591_v27 = vmax.f32 %v1467_v4, 0.0  ;;  %v1623_v6 = vpack.c.bf16 %v1593_v23, %v1592_v28  ;;  %v2830_v23 = vld [vmem:[#allocation14 + $0x10] sm:$0xff]   ;;  %v2831_v28 = vld [vmem:[#allocation14 + $0x8] sm:$0xff]  }
 0x3d2   :  { %2682 = vmatprep.subr.bf16.mxu0 %v2830_v23 }
 0x3d3   :  { %v1622_v31 = vpack.c.bf16 %v1591_v27, %v1590_v14  ;;  %2683 = vmatpush3.bf16.msra.mxu0 %v2830_v23 }
 0x3d4   :  { %2684 = vmatprep.subr.bf16.mxu0 %v2831_v28 }
 0x3d5   :  { %2640 = vmatprep.mubr.bf16.mxu1 %v1622_v31 }
 0x3d6   :  { %2641 = vmatmul.mubr.bf16.vlgmr.msra.gmra.mxu1 %v1623_v6 }
 0x3d7   :  { %2685 = vmatpush3.bf16.msra.mxu0 %v2831_v28 }
 0x3d8   :  { %v2598_v32 = vpop.f32.mrf.mxu1 }
 0x3d9   :  { %v1488_v57 = vadd.f32 %v2598_v32, %v3545_v18 }
 0x3da   :  { %v1479_v34 = vpop.f32.mrf.mxu1 }
 0x3db   :  { %v1480_v0 = vadd.f32 %v3545_v18, %v1479_v34  ;;  %v1596_v47 = vmax.f32 %v1488_v57, 0.0 }
 0x3dc   :  { %v2599_v38 = vpop.f32.mrf.mxu1 }
 0x3dd   :  { %v1491_v39 = vadd.f32 %v2599_v38, %v3545_v18  ;;  %v1594_v24 = vmax.f32 %v1480_v0, 0.0  ;;  %v2832_v38 = vld [vmem:[#allocation14] sm:$0xff]  }
 0x3de   :  { %v1482_v40 = vpop.f32.mrf.mxu1  ;;  %2686 = vmatprep.subr.bf16.mxu0 %v2832_v38 }
 0x3df   :  { %v1483_v41 = vadd.f32 %v3545_v18, %v1482_v40  ;;  %v1597_v42 = vmax.f32 %v1491_v39, 0.0  ;;  %2687 = vmatpush3.bf16.msra.mxu0 %v2832_v38 }
 0x3e1   :  { %v1595_v3 = vmax.f32 %v1483_v41, 0.0  ;;  %v1625_v25 = vpack.c.bf16 %v1597_v42, %v1596_v47 }
 0x3e3   :  { %v1624_v30 = vpack.c.bf16 %v1595_v3, %v1594_v24 }
 0x3e5   :  { %2644 = vmatprep.mubr.bf16.mxu1 %v1624_v30 }
 0x3e6   :  { %2645 = vmatmul.mubr.bf16.gmra.mxu1 %v1625_v25 }
 0x3e8   :  { %v2602_v50 = vpop.f32.mrf.mxu1 }
 0x3e9   :  { %v1504_v26 = vadd.f32 %v2602_v50, %v3545_v18 }
 0x3ea   :  { %v1495_v33 = vpop.f32.mrf.mxu1 }
 0x3eb   :  { %v1496_v54 = vadd.f32 %v3545_v18, %v1495_v33  ;;  %v1600_v62 = vmax.f32 %v1504_v26, 0.0 }
 0x3ec   :  { %v2603_v53 = vpop.f32.mrf.mxu1 }
 0x3ed   :  { %v1507_v55 = vadd.f32 %v2603_v53, %v3545_v18  ;;  %v1598_v35 = vmax.f32 %v1496_v54, 0.0 }
 0x3ee   :  { %v1498_v59 = vpop.f32.mrf.mxu1 }
 0x3ef   :  { %v1499_v60 = vadd.f32 %v3545_v18, %v1498_v59  ;;  %v1601_v61 = vmax.f32 %v1507_v55, 0.0 }
 0x3f1   :  { %v1599_v46 = vmax.f32 %v1499_v60, 0.0  ;;  %v1627_v43 = vpack.c.bf16 %v1601_v61, %v1600_v62 }
 0x3f3   :  { %v1626_v58 = vpack.c.bf16 %v1599_v46, %v1598_v35 }
 0x3f5   :  { %2648 = vmatprep.mubr.bf16.mxu1 %v1626_v58 }
 0x3f6   :  { %2649 = vmatmul.mubr.bf16.gmra.mxu1 %v1627_v43 }
 0x3f8   :  { %v2606_v48 = vpop.f32.mrf.mxu1 }
 0x3f9   :  { %v1520_v44 = vadd.f32 %v2606_v48, %v3545_v18 }
 0x3fa   :  { %v1511_v37 = vpop.f32.mrf.mxu1 }
 0x3fb   :  { %v1512_v2 = vadd.f32 %v3545_v18, %v1511_v37  ;;  %v1604_v52 = vmax.f32 %v1520_v44, 0.0 }
 0x3fc   :  { %v2607_v36 = vpop.f32.mrf.mxu1 }
 0x3fd   :  { %v1523_v49 = vadd.f32 %v2607_v36, %v3545_v18  ;;  %v1602_v7 = vmax.f32 %v1512_v2, 0.0 }
 0x3fe   :  { %v1514_v5 = vpop.f32.mrf.mxu1 }
 0x3ff   :  { %v1515_v56 = vadd.f32 %v3545_v18, %v1514_v5  ;;  %v1605_v45 = vmax.f32 %v1523_v49, 0.0 }
 0x401   :  { %v1603_v9 = vmax.f32 %v1515_v56, 0.0  ;;  %v1629_v1 = vpack.c.bf16 %v1605_v45, %v1604_v52 }
 0x403   :  { %v1628_v10 = vpack.c.bf16 %v1603_v9, %v1602_v7 }
 0x405   :  { %2652 = vmatprep.mubr.bf16.mxu1 %v1628_v10  ;;  %v3582_v10 = vld [vmem:[%s3673_s11] ss:$0 sm:$0xff]  ;;  %s3124_s11 = smov [#allocation17]  }
 0x406   :  { %2653 = vmatmul.mubr.bf16.gmra.mxu1 %v1629_v1  ;;  %s2263_s18 = sshll.u32 %s3124_s11, 4  ;;  %s2264_s18 = int_to_ptr.vmem [resolvable:$true] %s2263_s18 }
 0x407   :  { %s3057_s1 = scalar_lea.vmem %s2264_s18, 8192  ;;  %p3062_p13 = scmp.lt.s32.totalorder %s2264_s18, %s2264_s18 }
 0x408   :  { %v2610_v12 = vpop.f32.mrf.mxu1  ;;  %p3058_p12 = scmp.ne.s32.totalorder %s2264_s18, %s3057_s1  ;;  %p3063_p0 = scmp.lt.s32.totalorder %s3057_s1, %s3057_s1 }
 0x409   :  { %v1536_v17 = vadd.f32 %v2610_v12, %v3545_v18 }
 0x40a   :  { %v1527_v13 = vpop.f32.mrf.mxu1  ;;  %p3064_p1 = por %p3063_p0, %p3062_p13 }
 0x40b   :  { %v1528_v11 = vadd.f32 %v3545_v18, %v1527_v13  ;;  %v1608_v22 = vmax.f32 %v1536_v17, 0.0 }
 0x40c   :  { %v2611_v15 = vpop.f32.mrf.mxu1  ;;  %p3065_p2 = pnand %p3064_p1, %p3058_p12 }
 0x40d   :  { %v1539_v16 = vadd.f32 %v2611_v15, %v3545_v18  ;;  %v1606_v21 = vmax.f32 %v1528_v11, 0.0 }
 0x40e   :  { %v1530_v51 = vpop.f32.mrf.mxu1 }
 0x40f   :  { %v1531_v19 = vadd.f32 %v3545_v18, %v1530_v51  ;;  %v1609_v20 = vmax.f32 %v1539_v16, 0.0 }
 0x411   :  { %v1607_v63 = vmax.f32 %v1531_v19, 0.0  ;;  %v1631_v4 = vpack.c.bf16 %v1609_v20, %v1608_v22 }
 0x413   :  { %v1630_v8 = vpack.c.bf16 %v1607_v63, %v1606_v21 }
 0x415   :  { %2656 = vmatprep.mubr.bf16.mxu1 %v1630_v8 }
 0x416   :  { %2657 = vmatmul.mubr.bf16.gmra.mxu1 %v1631_v4 }
 0x418   :  { %v2614_v14 = vpop.f32.mrf.mxu1 }
 0x419   :  { %v1552_v32 = vadd.f32 %v2614_v14, %v3545_v18 }
 0x41a   :  { %v1543_v27 = vpop.f32.mrf.mxu1 }
 0x41b   :  { %v1544_v31 = vadd.f32 %v3545_v18, %v1543_v27  ;;  %v1612_v41 = vmax.f32 %v1552_v32, 0.0 }
 0x41c   :  { %v2615_v29 = vpop.f32.mrf.mxu1 }
 0x41d   :  { %v1555_v6 = vadd.f32 %v2615_v29, %v3545_v18  ;;  %v1610_v57 = vmax.f32 %v1544_v31, 0.0 }
 0x41e   :  { %v1546_v34 = vpop.f32.mrf.mxu1 }
 0x41f   :  { %v1547_v0 = vadd.f32 %v3545_v18, %v1546_v34  ;;  %v1613_v39 = vmax.f32 %v1555_v6, 0.0 }
 0x421   :  { %v1611_v40 = vmax.f32 %v1547_v0, 0.0  ;;  %v1633_v24 = vpack.c.bf16 %v1613_v39, %v1612_v41 }
 0x423   :  { %v1632_v42 = vpack.c.bf16 %v1611_v40, %v1610_v57 }
 0x425   :  { %2660 = vmatprep.mubr.bf16.mxu1 %v1632_v42 }
 0x426   :  { %2661 = vmatmul.mubr.bf16.gmra.mxu1 %v1633_v24 }
 0x428   :  { %v2618_v3 = vpop.f32.mrf.mxu1 }
 0x429   :  { %v1568_v33 = vadd.f32 %v2618_v3, %v3545_v18 }
 0x42a   :  { %v1559_v47 = vpop.f32.mrf.mxu1 }
 0x42b   :  { %v1560_v25 = vadd.f32 %v3545_v18, %v1559_v47  ;;  %v1616_v60 = vmax.f32 %v1568_v33, 0.0 }
 0x42c   :  { %v2619_v30 = vpop.f32.mrf.mxu1 }
 0x42d   :  { %v1571_v50 = vadd.f32 %v2619_v30, %v3545_v18  ;;  %v1614_v26 = vmax.f32 %v1560_v25, 0.0 }
 0x42e   :  { %v1562_v53 = vpop.f32.mrf.mxu1 }
 0x42f   :  { %v1563_v54 = vadd.f32 %v3545_v18, %v1562_v53  ;;  %v1617_v55 = vmax.f32 %v1571_v50, 0.0 }
 0x431   :  { %v1615_v59 = vmax.f32 %v1563_v54, 0.0  ;;  %v1635_v35 = vpack.c.bf16 %v1617_v55, %v1616_v60 }
 0x433   :  { %v1634_v61 = vpack.c.bf16 %v1615_v59, %v1614_v26 }
 0x435   :  { %2664 = vmatprep.mubr.bf16.mxu1 %v1634_v61 }
 0x436   :  { %2665 = vmatmul.mubr.bf16.gmra.mxu1 %v1635_v35 }
 0x438   :  { %v2622_v46 = vpop.f32.mrf.mxu1 }
 0x439   :  { %v1584_v37 = vadd.f32 %v2622_v46, %v3545_v18 }
 0x43a   :  { %v1575_v62 = vpop.f32.mrf.mxu1 }
 0x43b   :  { %v1576_v43 = vadd.f32 %v3545_v18, %v1575_v62  ;;  %v1620_v56 = vmax.f32 %v1584_v37, 0.0 }
 0x43c   :  { %v2623_v58 = vpop.f32.mrf.mxu1 }
 0x43d   :  { %v1587_v48 = vadd.f32 %v2623_v58, %v3545_v18  ;;  %v1618_v44 = vmax.f32 %v1576_v43, 0.0 }
 0x43e   :  { %v1578_v36 = vpop.f32.mrf.mxu1 }
 0x43f   :  { %v1579_v2 = vadd.f32 %v3545_v18, %v1578_v36  ;;  %v1621_v49 = vmax.f32 %v1587_v48, 0.0 }
 0x441   :  { %v1619_v5 = vmax.f32 %v1579_v2, 0.0  ;;  %v1637_v7 = vpack.c.bf16 %v1621_v49, %v1620_v56 }
 0x443   :  { %v1636_v45 = vpack.c.bf16 %v1619_v5, %v1618_v44 }
 0x445   :  { %2668 = vmatprep.mubr.bf16.mxu1 %v1636_v45 }
 0x446   :  { %2669 = vmatmul.mubr.bf16.gmra.mxu1 %v1637_v7 }
 0x496   :  { %v2642_v9 = vpop.f32.mrf.mxu1 }
 0x497   :  { %v1752_v13 = vadd.f32 %v2642_v9, %v3582_v10 }
 0x498   :  { %v1743_v52 = vpop.f32.mrf.mxu1 }
 0x499   :  { %v1744_v12 = vadd.f32 %v3582_v10, %v1743_v52  ;;  %v1872_v19 = vmax.f32 %v1752_v13, 0.0 }
 0x49a   :  { %v2643_v1 = vpop.f32.mrf.mxu1 }
 0x49b   :  { %v1755_v18 = vadd.f32 %v2643_v1, %v3582_v10  ;;  %v1870_v17 = vmax.f32 %v1744_v12, 0.0 }
 0x49c   :  { %v1746_v15 = vpop.f32.mrf.mxu1 }
 0x49d   :  { %v1747_v11 = vadd.f32 %v3582_v10, %v1746_v15  ;;  %v1873_v16 = vmax.f32 %v1755_v18, 0.0 }
 0x49f   :  { %v1871_v51 = vmax.f32 %v1747_v11, 0.0  ;;  %v1903_v21 = vpack.c.bf16 %v1873_v16, %v1872_v19 }
 0x4a1   :  { %v1902_v20 = vpack.c.bf16 %v1871_v51, %v1870_v17 }
 0x4a3   :  { %2688 = vmatprep.mubr.bf16.mxu0 %v1902_v20 }
 0x4a4   :  { %2689 = vmatmul.mubr.bf16.vlgmr.msra.gmra.mxu0 %v1903_v21 }
 0x4a6   :  { %v2646_v63 = vpop.f32.mrf.mxu1 }
 0x4a7   :  { %v1768_v14 = vadd.f32 %v2646_v63, %v3582_v10 }
 0x4a8   :  { %v1759_v22 = vpop.f32.mrf.mxu1 }
 0x4a9   :  { %v1760_v4 = vadd.f32 %v3582_v10, %v1759_v22  ;;  %v1876_v32 = vmax.f32 %v1768_v14, 0.0 }
 0x4aa   :  { %v2647_v8 = vpop.f32.mrf.mxu1 }
 0x4ab   :  { %v1771_v23 = vadd.f32 %v2647_v8, %v3582_v10  ;;  %v1874_v31 = vmax.f32 %v1760_v4, 0.0 }
 0x4ac   :  { %v1762_v27 = vpop.f32.mrf.mxu1 }
 0x4ad   :  { %v1763_v28 = vadd.f32 %v3582_v10, %v1762_v27  ;;  %v1877_v29 = vmax.f32 %v1771_v23, 0.0 }
 0x4af   :  { %v1875_v6 = vmax.f32 %v1763_v28, 0.0  ;;  %v1905_v38 = vpack.c.bf16 %v1877_v29, %v1876_v32 }
 0x4b1   :  { %v1904_v34 = vpack.c.bf16 %v1875_v6, %v1874_v31 }
 0x4b3   :  { %2692 = vmatprep.mubr.bf16.mxu0 %v1904_v34 }
 0x4b4   :  { %2693 = vmatmul.mubr.bf16.gmra.mxu0 %v1905_v38 }
 0x4b6   :  { %v2650_v0 = vpop.f32.mrf.mxu1 }
 0x4b7   :  { %v1784_v42 = vadd.f32 %v2650_v0, %v3582_v10 }
 0x4b8   :  { %v1775_v39 = vpop.f32.mrf.mxu1 }
 0x4b9   :  { %v1776_v40 = vadd.f32 %v3582_v10, %v1775_v39  ;;  %v1880_v50 = vmax.f32 %v1784_v42, 0.0 }
 0x4ba   :  { %v2651_v57 = vpop.f32.mrf.mxu1 }
 0x4bb   :  { %v1787_v41 = vadd.f32 %v2651_v57, %v3582_v10  ;;  %v1878_v30 = vmax.f32 %v1776_v40, 0.0 }
 0x4bc   :  { %v1778_v24 = vpop.f32.mrf.mxu1 }
 0x4bd   :  { %v1779_v3 = vadd.f32 %v3582_v10, %v1778_v24  ;;  %v1881_v47 = vmax.f32 %v1787_v41, 0.0 }
 0x4bf   :  { %v1879_v25 = vmax.f32 %v1779_v3, 0.0  ;;  %v1907_v53 = vpack.c.bf16 %v1881_v47, %v1880_v50 }
 0x4c1   :  { %v1906_v33 = vpack.c.bf16 %v1879_v25, %v1878_v30 }
 0x4c3   :  { %2696 = vmatprep.mubr.bf16.mxu0 %v1906_v33 }
 0x4c4   :  { %2697 = vmatmul.mubr.bf16.gmra.mxu0 %v1907_v53 }
 0x4c6   :  { %v2654_v54 = vpop.f32.mrf.mxu1 }
 0x4c7   :  { %v1800_v61 = vadd.f32 %v2654_v54, %v3582_v10 }
 0x4c8   :  { %v1791_v55 = vpop.f32.mrf.mxu1 }
 0x4c9   :  { %v1792_v59 = vadd.f32 %v3582_v10, %v1791_v55  ;;  %v1884_v48 = vmax.f32 %v1800_v61, 0.0 }
 0x4ca   :  { %v2655_v26 = vpop.f32.mrf.mxu1 }
 0x4cb   :  { %v1803_v60 = vadd.f32 %v2655_v26, %v3582_v10  ;;  %v1882_v58 = vmax.f32 %v1792_v59, 0.0 }
 0x4cc   :  { %v1794_v35 = vpop.f32.mrf.mxu1 }
 0x4cd   :  { %v1795_v46 = vadd.f32 %v3582_v10, %v1794_v35  ;;  %v1885_v62 = vmax.f32 %v1803_v60, 0.0 }
 0x4cf   :  { %v1883_v43 = vmax.f32 %v1795_v46, 0.0  ;;  %v1909_v36 = vpack.c.bf16 %v1885_v62, %v1884_v48 }
 0x4d1   :  { %v1908_v37 = vpack.c.bf16 %v1883_v43, %v1882_v58 }
 0x4d3   :  { %2700 = vmatprep.mubr.bf16.mxu0 %v1908_v37 }
 0x4d4   :  { %2701 = vmatmul.mubr.bf16.gmra.mxu0 %v1909_v36 }
 0x4d6   :  { %v2658_v2 = vpop.f32.mrf.mxu1 }
 0x4d7   :  { %v1816_v45 = vadd.f32 %v2658_v2, %v3582_v10 }
 0x4d8   :  { %v1807_v49 = vpop.f32.mrf.mxu1 }
 0x4d9   :  { %v1808_v5 = vadd.f32 %v3582_v10, %v1807_v49  ;;  %v1888_v18 = vmax.f32 %v1816_v45, 0.0 }
 0x4da   :  { %v2659_v44 = vpop.f32.mrf.mxu1 }
 0x4db   :  { %v1819_v56 = vadd.f32 %v2659_v44, %v3582_v10  ;;  %v1886_v1 = vmax.f32 %v1808_v5, 0.0 }
 0x4dc   :  { %v1810_v7 = vpop.f32.mrf.mxu1 }
 0x4dd   :  { %v1811_v9 = vadd.f32 %v3582_v10, %v1810_v7  ;;  %v1889_v52 = vmax.f32 %v1819_v56, 0.0 }
 0x4df   :  { %v1887_v12 = vmax.f32 %v1811_v9, 0.0  ;;  %v1911_v15 = vpack.c.bf16 %v1889_v52, %v1888_v18 }
 0x4e1   :  { %v1910_v13 = vpack.c.bf16 %v1887_v12, %v1886_v1 }
 0x4e3   :  { %2704 = vmatprep.mubr.bf16.mxu0 %v1910_v13 }
 0x4e4   :  { %2705 = vmatmul.mubr.bf16.gmra.mxu0 %v1911_v15 }
 0x4e6   :  { %v2662_v11 = vpop.f32.mrf.mxu1 }
 0x4e7   :  { %v1832_v20 = vadd.f32 %v2662_v11, %v3582_v10 }
 0x4e8   :  { %v1823_v16 = vpop.f32.mrf.mxu1 }
 0x4e9   :  { %v1824_v51 = vadd.f32 %v3582_v10, %v1823_v16  ;;  %v1892_v23 = vmax.f32 %v1832_v20, 0.0 }
 0x4ea   :  { %v2663_v17 = vpop.f32.mrf.mxu1 }
 0x4eb   :  { %v1835_v19 = vadd.f32 %v2663_v17, %v3582_v10  ;;  %v1890_v8 = vmax.f32 %v1824_v51, 0.0 }
 0x4ec   :  { %v1826_v21 = vpop.f32.mrf.mxu1 }
 0x4ed   :  { %v1827_v63 = vadd.f32 %v3582_v10, %v1826_v21  ;;  %v1893_v22 = vmax.f32 %v1835_v19, 0.0 }
 0x4ef   :  { %v1891_v4 = vmax.f32 %v1827_v63, 0.0  ;;  %v1913_v27 = vpack.c.bf16 %v1893_v22, %v1892_v23 }
 0x4f1   :  { %v1912_v14 = vpack.c.bf16 %v1891_v4, %v1890_v8 }
 0x4f3   :  { %2708 = vmatprep.mubr.bf16.mxu0 %v1912_v14 }
 0x4f4   :  { %2709 = vmatmul.mubr.bf16.gmra.mxu0 %v1913_v27 }
 0x4f6   :  { %v2666_v28 = vpop.f32.mrf.mxu1 }
 0x4f7   :  { %v1848_v34 = vadd.f32 %v2666_v28, %v3582_v10 }
 0x4f8   :  { %v1839_v29 = vpop.f32.mrf.mxu1 }
 0x4f9   :  { %v1840_v6 = vadd.f32 %v3582_v10, %v1839_v29  ;;  %v1896_v41 = vmax.f32 %v1848_v34, 0.0 }
 0x4fa   :  { %v2667_v31 = vpop.f32.mrf.mxu1 }
 0x4fb   :  { %v1851_v32 = vadd.f32 %v2667_v31, %v3582_v10  ;;  %v1894_v57 = vmax.f32 %v1840_v6, 0.0 }
 0x4fc   :  { %v1842_v38 = vpop.f32.mrf.mxu1 }
 0x4fd   :  { %v1843_v0 = vadd.f32 %v3582_v10, %v1842_v38  ;;  %v1897_v39 = vmax.f32 %v1851_v32, 0.0 }
 0x4ff   :  { %v1895_v40 = vmax.f32 %v1843_v0, 0.0  ;;  %v1915_v24 = vpack.c.bf16 %v1897_v39, %v1896_v41 }
 0x501   :  { %v1914_v42 = vpack.c.bf16 %v1895_v40, %v1894_v57 }
 0x503   :  { %2712 = vmatprep.mubr.bf16.mxu0 %v1914_v42 }
 0x504   :  { %2713 = vmatmul.mubr.bf16.gmra.mxu0 %v1915_v24 }
 0x506   :  { %v2670_v3 = vpop.f32.mrf.mxu1 }
 0x507   :  { %v1864_v33 = vadd.f32 %v2670_v3, %v3582_v10 }
 0x508   :  { %v1855_v47 = vpop.f32.mrf.mxu1 }
 0x509   :  { %v1856_v25 = vadd.f32 %v3582_v10, %v1855_v47  ;;  %v1900_v60 = vmax.f32 %v1864_v33, 0.0 }
 0x50a   :  { %v2671_v30 = vpop.f32.mrf.mxu1 }
 0x50b   :  { %v1867_v50 = vadd.f32 %v2671_v30, %v3582_v10  ;;  %v1898_v26 = vmax.f32 %v1856_v25, 0.0 }
 0x50c   :  { %v1858_v53 = vpop.f32.mrf.mxu1 }
 0x50d   :  { %v1859_v54 = vadd.f32 %v3582_v10, %v1858_v53  ;;  %v1901_v55 = vmax.f32 %v1867_v50, 0.0 }
 0x50f   :  { %v1899_v59 = vmax.f32 %v1859_v54, 0.0  ;;  %v1917_v35 = vpack.c.bf16 %v1901_v55, %v1900_v60 }
 0x511   :  { %v1916_v61 = vpack.c.bf16 %v1899_v59, %v1898_v26 }
 0x513   :  { %2716 = vmatprep.mubr.bf16.mxu0 %v1916_v61 }
 0x514   :  { %2717 = vmatmul.mubr.bf16.gmra.mxu0 %v1917_v35 }
 0x515   :  { %3068 = shalt.err (!%p3065_p2)
}
 0x516   :  { %s3125_s19 = smov 256   ;;  %s3126_s0 = smov 16   ;;  %v3622_v10 = vld [vmem:[%s3675_s13] ss:$0 sm:$0xff] }
 0x517   :  { %2269 = dma.vmem_to_hbm [thread:$0]  %s2264_s18, 8192, %s3677_s15, [#allocation18], %s3125_s19, %s3125_s19, %s3126_s0  }
 0x518   :  { %s3127_s13 = smov [#allocation16]  }
 0x519   :  { %s2251_s15 = sshll.u32 %s3127_s13, 4  ;;  %s2252_s15 = int_to_ptr.vmem [resolvable:$true] %s2251_s15 }
 0x51a   :  { %s3077_s25 = scalar_lea.vmem %s2252_s15, 4096  ;;  %p3082_p4 = scmp.lt.s32.totalorder %s2252_s15, %s2252_s15 }
 0x51b   :  { %p3078_p3 = scmp.ne.s32.totalorder %s2252_s15, %s3077_s25  ;;  %p3083_p5 = scmp.lt.s32.totalorder %s3077_s25, %s3077_s25 }
 0x51d   :  { %p3084_p6 = por %p3083_p5, %p3082_p4 }
 0x51f   :  { %p3085_p7 = pnand %p3084_p6, %p3078_p3 }
 0x564   :  { %v2690_v46 = vpop.f32.mrf.mxu0 }
 0x565   :  { %v2032_v62 = vadd.f32 %v2690_v46, %v3622_v10 }
 0x566   :  { %v2023_v58 = vpop.f32.mrf.mxu0 }
 0x567   :  { %2152 = vst [vmem:[#allocation16 + $0x10] sm:$0xff] %v2032_v62  ;;  %v2024_v43 = vadd.f32 %v3622_v10, %v2023_v58 }
 0x568   :  { %v2691_v48 = vpop.f32.mrf.mxu0 }
 0x569   :  { %2150 = vst [vmem:[#allocation16] sm:$0xff] %v2024_v43  ;;  %v2035_v37 = vadd.f32 %v2691_v48, %v3622_v10 }
 0x56a   :  { %v2026_v36 = vpop.f32.mrf.mxu0 }
 0x56b   :  { %2153 = vst [vmem:[#allocation16 + $0x18] sm:$0xff] %v2035_v37  ;;  %v2027_v2 = vadd.f32 %v3622_v10, %v2026_v36 }
 0x56d   :  { %2151 = vst [vmem:[#allocation16 + $0x8] sm:$0xff] %v2027_v2 }
 0x574   :  { %v2694_v49 = vpop.f32.mrf.mxu0 }
 0x575   :  { %v2048_v44 = vadd.f32 %v2694_v49, %v3622_v10 }
 0x576   :  { %v2039_v5 = vpop.f32.mrf.mxu0 }
 0x577   :  { %2156 = vst [vmem:[#allocation16 + $0x30] sm:$0xff] %v2048_v44  ;;  %v2040_v56 = vadd.f32 %v3622_v10, %v2039_v5 }
 0x578   :  { %v2695_v45 = vpop.f32.mrf.mxu0 }
 0x579   :  { %2154 = vst [vmem:[#allocation16 + $0x20] sm:$0xff] %v2040_v56  ;;  %v2051_v7 = vadd.f32 %v2695_v45, %v3622_v10 }
 0x57a   :  { %v2042_v9 = vpop.f32.mrf.mxu0 }
 0x57b   :  { %2157 = vst [vmem:[#allocation16 + $0x38] sm:$0xff] %v2051_v7  ;;  %v2043_v52 = vadd.f32 %v3622_v10, %v2042_v9 }
 0x57d   :  { %2155 = vst [vmem:[#allocation16 + $0x28] sm:$0xff] %v2043_v52 }
 0x584   :  { %v2698_v1 = vpop.f32.mrf.mxu0 }
 0x585   :  { %v2064_v12 = vadd.f32 %v2698_v1, %v3622_v10 }
 0x586   :  { %v2055_v18 = vpop.f32.mrf.mxu0 }
 0x587   :  { %2160 = vst [vmem:[#allocation16 + $0x50] sm:$0xff] %v2064_v12  ;;  %v2056_v13 = vadd.f32 %v3622_v10, %v2055_v18 }
 0x588   :  { %v2699_v15 = vpop.f32.mrf.mxu0 }
 0x589   :  { %2158 = vst [vmem:[#allocation16 + $0x40] sm:$0xff] %v2056_v13  ;;  %v2067_v11 = vadd.f32 %v2699_v15, %v3622_v10 }
 0x58a   :  { %v2058_v16 = vpop.f32.mrf.mxu0 }
 0x58b   :  { %2161 = vst [vmem:[#allocation16 + $0x58] sm:$0xff] %v2067_v11  ;;  %v2059_v17 = vadd.f32 %v3622_v10, %v2058_v16 }
 0x58d   :  { %2159 = vst [vmem:[#allocation16 + $0x48] sm:$0xff] %v2059_v17 }
 0x594   :  { %v2702_v51 = vpop.f32.mrf.mxu0 }
 0x595   :  { %v2080_v19 = vadd.f32 %v2702_v51, %v3622_v10 }
 0x596   :  { %v2071_v20 = vpop.f32.mrf.mxu0 }
 0x597   :  { %2164 = vst [vmem:[#allocation16 + $0x70] sm:$0xff] %v2080_v19  ;;  %v2072_v21 = vadd.f32 %v3622_v10, %v2071_v20 }
 0x598   :  { %v2703_v63 = vpop.f32.mrf.mxu0 }
 0x599   :  { %2162 = vst [vmem:[#allocation16 + $0x60] sm:$0xff] %v2072_v21  ;;  %v2083_v22 = vadd.f32 %v2703_v63, %v3622_v10 }
 0x59a   :  { %v2074_v8 = vpop.f32.mrf.mxu0 }
 0x59b   :  { %2165 = vst [vmem:[#allocation16 + $0x78] sm:$0xff] %v2083_v22  ;;  %v2075_v4 = vadd.f32 %v3622_v10, %v2074_v8 }
 0x59d   :  { %2163 = vst [vmem:[#allocation16 + $0x68] sm:$0xff] %v2075_v4 }
 0x5a4   :  { %v2706_v23 = vpop.f32.mrf.mxu0 }
 0x5a5   :  { %v2096_v14 = vadd.f32 %v2706_v23, %v3622_v10 }
 0x5a6   :  { %v2087_v27 = vpop.f32.mrf.mxu0 }
 0x5a7   :  { %2168 = vst [vmem:[#allocation16 + $0x90] sm:$0xff] %v2096_v14  ;;  %v2088_v28 = vadd.f32 %v3622_v10, %v2087_v27 }
 0x5a8   :  { %v2707_v29 = vpop.f32.mrf.mxu0 }
 0x5a9   :  { %2166 = vst [vmem:[#allocation16 + $0x80] sm:$0xff] %v2088_v28  ;;  %v2099_v31 = vadd.f32 %v2707_v29, %v3622_v10 }
 0x5aa   :  { %v2090_v6 = vpop.f32.mrf.mxu0 }
 0x5ab   :  { %2169 = vst [vmem:[#allocation16 + $0x98] sm:$0xff] %v2099_v31  ;;  %v2091_v32 = vadd.f32 %v3622_v10, %v2090_v6 }
 0x5ad   :  { %2167 = vst [vmem:[#allocation16 + $0x88] sm:$0xff] %v2091_v32 }
 0x5b4   :  { %v2710_v34 = vpop.f32.mrf.mxu0 }
 0x5b5   :  { %v2112_v38 = vadd.f32 %v2710_v34, %v3622_v10 }
 0x5b6   :  { %v2103_v0 = vpop.f32.mrf.mxu0 }
 0x5b7   :  { %2172 = vst [vmem:[#allocation16 + $0xb0] sm:$0xff] %v2112_v38  ;;  %v2104_v39 = vadd.f32 %v3622_v10, %v2103_v0 }
 0x5b8   :  { %v2711_v57 = vpop.f32.mrf.mxu0 }
 0x5b9   :  { %2170 = vst [vmem:[#allocation16 + $0xa0] sm:$0xff] %v2104_v39  ;;  %v2115_v40 = vadd.f32 %v2711_v57, %v3622_v10 }
 0x5ba   :  { %v2106_v41 = vpop.f32.mrf.mxu0 }
 0x5bb   :  { %2173 = vst [vmem:[#allocation16 + $0xb8] sm:$0xff] %v2115_v40  ;;  %v2107_v42 = vadd.f32 %v3622_v10, %v2106_v41 }
 0x5bd   :  { %2171 = vst [vmem:[#allocation16 + $0xa8] sm:$0xff] %v2107_v42 }
 0x5c4   :  { %v2714_v24 = vpop.f32.mrf.mxu0 }
 0x5c5   :  { %v2128_v3 = vadd.f32 %v2714_v24, %v3622_v10 }
 0x5c6   :  { %v2119_v47 = vpop.f32.mrf.mxu0 }
 0x5c7   :  { %2176 = vst [vmem:[#allocation16 + $0xd0] sm:$0xff] %v2128_v3  ;;  %v2120_v30 = vadd.f32 %v3622_v10, %v2119_v47 }
 0x5c8   :  { %v2715_v25 = vpop.f32.mrf.mxu0 }
 0x5c9   :  { %2174 = vst [vmem:[#allocation16 + $0xc0] sm:$0xff] %v2120_v30  ;;  %v2131_v50 = vadd.f32 %v2715_v25, %v3622_v10 }
 0x5ca   :  { %v2122_v33 = vpop.f32.mrf.mxu0 }
 0x5cb   :  { %2177 = vst [vmem:[#allocation16 + $0xd8] sm:$0xff] %v2131_v50  ;;  %v2123_v53 = vadd.f32 %v3622_v10, %v2122_v33 }
 0x5cd   :  { %2175 = vst [vmem:[#allocation16 + $0xc8] sm:$0xff] %v2123_v53 }
 0x5d4   :  { %v2718_v54 = vpop.f32.mrf.mxu0 }
 0x5d5   :  { %v2144_v55 = vadd.f32 %v2718_v54, %v3622_v10 }
 0x5d6   :  { %v2135_v26 = vpop.f32.mrf.mxu0 }
 0x5d7   :  { %2180 = vst [vmem:[#allocation16 + $0xf0] sm:$0xff] %v2144_v55  ;;  %v2136_v59 = vadd.f32 %v3622_v10, %v2135_v26 }
 0x5d8   :  { %v2719_v60 = vpop.f32.mrf.mxu0 }
 0x5d9   :  { %2178 = vst [vmem:[#allocation16 + $0xe0] sm:$0xff] %v2136_v59  ;;  %v2147_v61 = vadd.f32 %v2719_v60, %v3622_v10 }
 0x5da   :  { %v2138_v35 = vpop.f32.mrf.mxu0 }
 0x5db   :  { %2181 = vst [vmem:[#allocation16 + $0xf8] sm:$0xff] %v2147_v61  ;;  %v2139_v46 = vadd.f32 %v3622_v10, %v2138_v35 }
 0x5dd   :  { %2179 = vst [vmem:[#allocation16 + $0xe8] sm:$0xff] %v2139_v46 }
 0x5de   :  { %3088 = shalt.err (!%p3085_p7)
}
 0x5df   :  { %2257 = dma.vmem_to_hbm [thread:$0]  %s2252_s15, 4096, %s3676_s14, [#allocation4], %s3112_s21, %s3112_s21, %s3113_s22  }
 0x5e0   :  { %3107 = dma.done.wait [#allocation4], 4096  }
 0x5e1   :  { %3108 = vsyncadd [#allocation4], 4294963200 }
 0x5e2   :  { %3109 = dma.done.wait [#allocation18], 8192  }
 0x5e3   :  { %3110 = vsyncadd [#allocation18], 4294959104 }
 0x5e4   :  { %2276 = vsyncpa [#allocation3], 1 }
 0x5e5   :  { %2277 = vsyncpa [#allocation6], 1 }
 0x5e6   :  { %2278 = vsyncpa [#allocation9], 1 }
 0x5e7   :  { %2279 = vsyncpa [#allocation12], 1 }
 0x5e8   :  { %2280 = vsyncpa [#allocation15], 1 }
 0x5e9   :  { %2281 = vsyncpa [#allocation4], 1 }
 0x5ea   :  { %2282 = vsyncpa [#allocation18], 1 }

</bundles_post_ra>
